<compile_context>
chip_gen: v7x
topology: tpu7x:2x2x1
jax: 0.10.0
libtpu: 0.0.40
codegen_flags: <defaults>
</compile_context>

<pallas_src>
import jax
import jax.numpy as jnp
from jax.experimental import pallas as pl
from jax.experimental.pallas import tpu as pltpu


def latent_ou_encoder_kernel(h_ref, mw_ref,
                             w_a_ref, b_a_ref,
                             w_b_ref, b_b_ref,
                             w_c_ref, b_c_ref,
                             out_ref,
                             acc_ref):
    """grid = (batch blocks, S blocks); the S axis is a streaming reduce."""
    s = pl.program_id(1)

    @pl.when(s == 0)
    def _():
        acc_ref[...] = jnp.zeros_like(acc_ref)

    # Masked-mean partial sum on the VPU (+ sublane reduce on the XLU slot).
    # mw already holds mask / partition (f32), so acc converges to the masked
    # mean with no in-kernel divide.  NOTE: at toy E=32 the hidden block only
    # fills 32/128 lanes; at bart-base scale (E=768) it is lane-dense.
    h = h_ref[...]                                  # (bt, st, E)  bf16
    w = mw_ref[...]                                 # (bt, st, 1)  f32
    acc_ref[...] += jnp.sum(h.astype(jnp.float32) * w, axis=1)

    @pl.when(s == pl.num_programs(1) - 1)
    def _():
        emb = acc_ref[...]                          # (bt, E) masked mean, f32
        # mlp + feature_extractor[0] were pre-fused into w_a/b_a (wrapper).
        z = jnp.dot(emb, w_a_ref[...],
                    preferred_element_type=jnp.float32) + b_a_ref[...]
        z = jnp.maximum(z, 0.0)
        z = jnp.dot(z, w_b_ref[...],
                    preferred_element_type=jnp.float32) + b_b_ref[...]
        z = jnp.maximum(z, 0.0)
        z = jnp.dot(z, w_c_ref[...],
                    preferred_element_type=jnp.float32) + b_c_ref[...]
        out_ref[...] = z.astype(out_ref.dtype)      # lane-dense (l_pad = k*128)


def _round_up(x, m):
    return (x + m - 1) // m * m


def latent_ou_encoder_forward(hidden_states, attention_mask, params, *,
                              b_tile=None, s_tile=None,
                              target_block_bytes=4 << 20,
                              vmem_limit_bytes=48 << 20):
    """Masked-mean pooling + mlp + feature_extractor in one Pallas kernel."""
    B, S, E = hidden_states.shape
    H = params["w_mlp"].shape[1]
    LAT = params["w3"].shape[1]
    f32 = jnp.float32

    # ---- tiling -------------------------------------------------------------
    # Batch: an even number of batch blocks lets v7x's two TensorCores split
    # the "parallel" axis; on single-TC chips (v5e/v6e) pass b_tile=B instead.
    if b_tile is None:
        b_tile = B // 2 if (B > 8 and (B // 2) % 8 == 0) else B
    assert B % b_tile == 0 and (b_tile == B or b_tile % 8 == 0), (B, b_tile)

    # Sequence: biggest block whose bf16 hidden slab fits target_block_bytes
    # per pipeline buffer (Pallas double-buffers it; in-kernel f32 promote /
    # product temporaries cost a few x more).  48 MiB vmem_limit keeps this
    # safe on v7x (64 MiB/TC); raise both knobs on v6e/v5e for bigger tiles.
    if s_tile is None:
        s_full = _round_up(S, 8)
        if b_tile * s_full * E * 2 <= target_block_bytes:
            s_tile = s_full
        else:
            s_tile = max(128, (target_block_bytes // (b_tile * E * 2)) // 128 * 128)
    s_pad = _round_up(S, s_tile)

    h_pad = _round_up(H, 128)
    l_pad = _round_up(LAT, 128)

    # ---- parameters: fold mlp into feature_extractor[0]; pad to lane width --
    # Exact: no nonlinearity between them, composition of affine maps is affine.
    w_a = params["w_mlp"].astype(f32) @ params["w1"].astype(f32)
    b_a = params["b_mlp"].astype(f32) @ params["w1"].astype(f32) + params["b1"].astype(f32)

    def pad2(a, rows, cols):
        a = a.astype(f32)
        return jnp.pad(a, ((0, rows - a.shape[0]), (0, cols - a.shape[1])))

    w_a = pad2(w_a, E, h_pad)
    b_a = pad2(b_a, 1, h_pad)
    w_b = pad2(params["w2"], h_pad, h_pad)
    b_b = pad2(params["b2"], 1, h_pad)
    w_c = pad2(params["w3"], h_pad, l_pad)
    b_c = pad2(params["b3"], 1, l_pad)

    # ---- activations ---------------------------------------------------------
    # Hidden states stream as bf16 (halves pooling DMA bytes); note the kernel
    # therefore matches a bf16-rounded version of the f32 PyTorch activations.
    h = jnp.pad(hidden_states.astype(jnp.bfloat16),
                ((0, 0), (0, s_pad - S), (0, 0)))
    mk = attention_mask.astype(f32)
    part = jnp.sum(mk, axis=1, keepdims=True)                    # (B, 1)
    # Pre-divide the mask by its (clamped) partition so the kernel's running
    # sum is already the masked mean: removes the per-step lane reduce and the
    # in-kernel divide.  Fully-masked rows yield 0 instead of NaN (documented
    # divergence from PyTorch).
    mw = mk / jnp.maximum(part, 1.0)
    mw = jnp.pad(mw, ((0, 0), (0, s_pad - S)))[:, :, None]       # (B, s_pad, 1) f32

    grid = (B // b_tile, s_pad // s_tile)
    const = lambda b, s: (0, 0)   # weights: same block every step -> VMEM resident
    # TODO(synk): at bart-base scale, add pipeline_mode=pl.Buffered(1) to the
    # constant weight specs (and/or cast w_b/w_c to bf16) to drop their unused
    # second pipeline buffer — extra headroom on v7x's 64 MiB VMEM.

    grid_spec = pltpu.PrefetchScalarGridSpec(
        num_scalar_prefetch=0,
        grid=grid,
        in_specs=[
            pl.BlockSpec((b_tile, s_tile, E), lambda b, s: (b, s, 0)),   # hidden
            pl.BlockSpec((b_tile, s_tile, 1), lambda b, s: (b, s, 0)),   # mask/part
            pl.BlockSpec((E, h_pad), const),
            pl.BlockSpec((1, h_pad), const),
            pl.BlockSpec((h_pad, h_pad), const),
            pl.BlockSpec((1, h_pad), const),
            pl.BlockSpec((h_pad, l_pad), const),
            pl.BlockSpec((1, l_pad), const),
        ],
        out_specs=pl.BlockSpec((b_tile, l_pad), lambda b, s: (b, 0)),
        scratch_shapes=[pltpu.VMEM((b_tile, E), jnp.float32)],   # masked-mean acc
    )

    weight_bytes = 4 * (E * h_pad + h_pad + h_pad * h_pad + h_pad
                        + h_pad * l_pad + l_pad)
    cost = pl.CostEstimate(
        flops=2 * B * s_pad * E
              + 2 * B * (E * h_pad + h_pad * h_pad + h_pad * l_pad),
        transcendentals=0,
        bytes_accessed=B * s_pad * E * 2        # bf16 hidden
                       + B * s_pad * 4          # f32 mask weights
                       + weight_bytes
                       + B * l_pad * 4,
    )

    out = pl.pallas_call(
        latent_ou_encoder_kernel,
        out_shape=jax.ShapeDtypeStruct((B, l_pad), jnp.float32),
        grid_spec=grid_spec,
        compiler_params=pltpu.CompilerParams(
            dimension_semantics=("parallel", "arbitrary"),
            vmem_limit_bytes=vmem_limit_bytes),
        cost_estimate=cost,
    )(h, mw, w_a, b_a, w_b, b_b, w_c, b_c)

    return out[:, :LAT]


def reference_forward(hidden_states, attention_mask, params):
    """Pure-JAX reference (unfused, unpadded) for correctness checking."""
    mk = attention_mask.astype(jnp.float32)
    masked = hidden_states * mk[:, :, None]
    emb = jnp.sum(masked, axis=1) / jnp.sum(mk, axis=1, keepdims=True)
    z = emb @ params["w_mlp"] + params["b_mlp"]
    z = jnp.maximum(z @ params["w1"] + params["b1"], 0.0)
    z = jnp.maximum(z @ params["w2"] + params["b2"], 0.0)
    return z @ params["w3"] + params["b3"]


if __name__ == "__main__":
    key = jax.random.PRNGKey(0)
    B, S = 16, 200            # batch, seq len
    E, H, LAT = 32, 32, 16    # embedding_dim, hidden_dim, latent_dim
    VOCAB = 64

    keys = jax.random.split(key, 8)

    # TODO(synk): the pretrained facebook/bart-base encoder stack (6-layer
    # transformer) is not reproduced here; a deterministic embedding-table
    # lookup stands in for encoder_hidden_states[0].
    embed_tbl = jax.random.normal(keys[0], (VOCAB, E), jnp.float32)

    def uinit(k, shape, fan_in):
        bound = 1.0 / jnp.sqrt(float(fan_in))
        return jax.random.uniform(k, shape, jnp.float32, -bound, bound)

    # Linear weights stored [in_features, out_features] (x @ W + b == PyTorch
    # x @ W.T + b); biases zeroed exactly as weights_init() does.
    params = {
        "w_mlp": uinit(keys[1], (E, H), E),
        "b_mlp": jnp.zeros((1, H), jnp.float32),
        "w1": uinit(keys[2], (H, H), H),
        "b1": jnp.zeros((1, H), jnp.float32),
        "w2": uinit(keys[3], (H, H), H),
        "b2": jnp.zeros((1, H), jnp.float32),
        "w3": uinit(keys[4], (H, LAT), H),
        "b3": jnp.zeros((1, LAT), jnp.float32),
    }

    input_ids = jax.random.randint(keys[5], (B, S), 0, VOCAB)
    attention_mask = (jax.random.uniform(keys[6], (B, S)) > 0.3).astype(jnp.float32)
    attention_mask = attention_mask.at[:, 0].set(1.0)   # no fully-masked rows

    # Glue in plain JAX: embedding lookup producing the "encoder hidden states".
    hidden_states = jnp.take(embed_tbl, input_ids, axis=0)   # (B, S, E)

    out = latent_ou_encoder_forward(hidden_states, attention_mask, params)
    out = jax.block_until_ready(out)

    # Reference consumes the same bf16-rounded hidden states the kernel sees.
    h_bf = hidden_states.astype(jnp.bfloat16).astype(jnp.float32)
    ref = reference_forward(h_bf, attention_mask, params)

    assert out.shape == (B, LAT), out.shape
    err = float(jnp.max(jnp.abs(out - ref)))
    assert jnp.allclose(out, ref, atol=5e-5, rtol=5e-4), \
        f"mismatch vs reference (max abs err {err})"

    print("KERNEL_OK")
</pallas_src>

<mosaic_0001>
module attributes {stable_mosaic.version = 11 : i64} {
  func.func @latent_ou_encoder_kernel(%arg0: i32, %arg1: i32, %arg2: memref<8x200x32xbf16, #tpu.memory_space<vmem>>, %arg3: memref<8x200x1xf32, #tpu.memory_space<vmem>>, %arg4: memref<32x128xf32, #tpu.memory_space<vmem>>, %arg5: memref<1x128xf32, #tpu.memory_space<vmem>>, %arg6: memref<128x128xf32, #tpu.memory_space<vmem>>, %arg7: memref<1x128xf32, #tpu.memory_space<vmem>>, %arg8: memref<128x128xf32, #tpu.memory_space<vmem>>, %arg9: memref<1x128xf32, #tpu.memory_space<vmem>>, %arg10: memref<8x128xf32, #tpu.memory_space<vmem>>, %arg11: memref<8x32xf32, #tpu.memory_space<vmem>>) attributes {dimension_semantics = [#tpu.dimension_semantics<parallel>, #tpu.dimension_semantics<arbitrary>], iteration_bounds = array<i64: 2, 1>, scalar_prefetch = 0 : i64, scratch_operands = 1 : i64, tpu.core_type = #tpu.core_type<tc>, window_params = [{transform_indices = @transform_0, window_bounds = array<i64: 8, 200, 32>}, {transform_indices = @transform_1, window_bounds = array<i64: 8, 200, 1>}, {pipeline_mode = #tpu.pipeline_mode<synchronous>, transform_indices = @transform_2, window_bounds = array<i64: 32, 128>}, {pipeline_mode = #tpu.pipeline_mode<synchronous>, transform_indices = @transform_3, window_bounds = array<i64: 1, 128>}, {pipeline_mode = #tpu.pipeline_mode<synchronous>, transform_indices = @transform_4, window_bounds = array<i64: 128, 128>}, {pipeline_mode = #tpu.pipeline_mode<synchronous>, transform_indices = @transform_5, window_bounds = array<i64: 1, 128>}, {pipeline_mode = #tpu.pipeline_mode<synchronous>, transform_indices = @transform_6, window_bounds = array<i64: 128, 128>}, {pipeline_mode = #tpu.pipeline_mode<synchronous>, transform_indices = @transform_7, window_bounds = array<i64: 1, 128>}, {transform_indices = @transform_8, window_bounds = array<i64: 8, 128>}]} {
    %c0_i32 = arith.constant 0 : i32
    %0 = arith.cmpi eq, %arg1, %c0_i32 : i32
    %1 = arith.extui %0 : i1 to i32
    %c0_i32_0 = arith.constant 0 : i32
    %2 = arith.cmpi ne, %1, %c0_i32_0 : i32
    scf.if %2 {
      %cst_12 = arith.constant 0.000000e+00 : f32
      %15 = vector.broadcast %cst_12 : f32 to vector<8x32xf32>
      %c0_13 = arith.constant 0 : index
      %c0_14 = arith.constant 0 : index
      %16 = vector.load %arg11[%c0_13, %c0_14] : memref<8x32xf32, #tpu.memory_space<vmem>>, vector<8x32xf32>
      tpu.vector_store %arg11[%c0_13, %c0_14], %15 {strides = array<i32>} : memref<8x32xf32, #tpu.memory_space<vmem>>, vector<8x32xf32>,
    } else {
    }
    %c0 = arith.constant 0 : index
    %c0_1 = arith.constant 0 : index
    %c0_2 = arith.constant 0 : index
    %3 = vector.load %arg2[%c0, %c0_1, %c0_2] : memref<8x200x32xbf16, #tpu.memory_space<vmem>>, vector<8x200x32xbf16>
    %c0_3 = arith.constant 0 : index
    %c0_4 = arith.constant 0 : index
    %c0_5 = arith.constant 0 : index
    %4 = vector.load %arg3[%c0_3, %c0_4, %c0_5] : memref<8x200x1xf32, #tpu.memory_space<vmem>>, vector<8x200x1xf32>
    %c0_6 = arith.constant 0 : index
    %c0_7 = arith.constant 0 : index
    %5 = vector.load %arg11[%c0_6, %c0_7] : memref<8x32xf32, #tpu.memory_space<vmem>>, vector<8x32xf32>
    %6 = arith.extf %3 : vector<8x200x32xbf16> to vector<8x200x32xf32>
    %7 = vector.broadcast %4 : vector<8x200x1xf32> to vector<8x200x32xf32>
    %8 = arith.mulf %6, %7 : vector<8x200x32xf32>
    %cst = arith.constant dense<0.000000e+00> : vector<8x32xf32>
    %9 = vector.multi_reduction <add>, %8, %cst [1] : vector<8x200x32xf32> to vector<8x32xf32>
    %10 = arith.addf %5, %9 : vector<8x32xf32>
    %c0_8 = arith.constant 0 : index
    %c0_9 = arith.constant 0 : index
    %11 = vector.load %arg11[%c0_8, %c0_9] : memref<8x32xf32, #tpu.memory_space<vmem>>, vector<8x32xf32>
    tpu.vector_store %arg11[%c0_8, %c0_9], %10 {strides = array<i32>} : memref<8x32xf32, #tpu.memory_space<vmem>>, vector<8x32xf32>,
    %c0_i32_10 = arith.constant 0 : i32
    %12 = arith.cmpi eq, %arg1, %c0_i32_10 : i32
    %13 = arith.extui %12 : i1 to i32
    %c0_i32_11 = arith.constant 0 : i32
    %14 = arith.cmpi ne, %13, %c0_i32_11 : i32
    scf.if %14 {
      %c0_12 = arith.constant 0 : index
      %c0_13 = arith.constant 0 : index
      %15 = vector.load %arg11[%c0_12, %c0_13] : memref<8x32xf32, #tpu.memory_space<vmem>>, vector<8x32xf32>
      %c0_14 = arith.constant 0 : index
      %c0_15 = arith.constant 0 : index
      %16 = vector.load %arg4[%c0_14, %c0_15] : memref<32x128xf32, #tpu.memory_space<vmem>>, vector<32x128xf32>
      %cst_16 = arith.constant dense<0.000000e+00> : vector<8x128xf32>
      %17 = tpu.matmul %15, %16, %cst_16 {dimension_numbers = #tpu.dot_dimension_numbers<[1], [0], [0], [1], [0, 0, 1, 1], [], []>} : vector<8x32xf32>, vector<32x128xf32>, vector<8x128xf32> -> vector<8x128xf32>
      %c0_17 = arith.constant 0 : index
      %c0_18 = arith.constant 0 : index
      %18 = vector.load %arg5[%c0_17, %c0_18] : memref<1x128xf32, #tpu.memory_space<vmem>>, vector<1x128xf32>
      %19 = vector.broadcast %18 : vector<1x128xf32> to vector<8x128xf32>
      %20 = arith.addf %17, %19 : vector<8x128xf32>
      %cst_19 = arith.constant 0.000000e+00 : f32
      %21 = vector.broadcast %cst_19 : f32 to vector<8x128xf32>
      %22 = arith.maximumf %20, %21 : vector<8x128xf32>
      %c0_20 = arith.constant 0 : index
      %c0_21 = arith.constant 0 : index
      %23 = vector.load %arg6[%c0_20, %c0_21] : memref<128x128xf32, #tpu.memory_space<vmem>>, vector<128x128xf32>
      %cst_22 = arith.constant dense<0.000000e+00> : vector<8x128xf32>
      %24 = tpu.matmul %22, %23, %cst_22 {dimension_numbers = #tpu.dot_dimension_numbers<[1], [0], [0], [1], [0, 0, 1, 1], [], []>} : vector<8x128xf32>, vector<128x128xf32>, vector<8x128xf32> -> vector<8x128xf32>
      %c0_23 = arith.constant 0 : index
      %c0_24 = arith.constant 0 : index
      %25 = vector.load %arg7[%c0_23, %c0_24] : memref<1x128xf32, #tpu.memory_space<vmem>>, vector<1x128xf32>
      %26 = vector.broadcast %25 : vector<1x128xf32> to vector<8x128xf32>
      %27 = arith.addf %24, %26 : vector<8x128xf32>
      %cst_25 = arith.constant 0.000000e+00 : f32
      %28 = vector.broadcast %cst_25 : f32 to vector<8x128xf32>
      %29 = arith.maximumf %27, %28 : vector<8x128xf32>
      %c0_26 = arith.constant 0 : index
      %c0_27 = arith.constant 0 : index
      %30 = vector.load %arg8[%c0_26, %c0_27] : memref<128x128xf32, #tpu.memory_space<vmem>>, vector<128x128xf32>
      %cst_28 = arith.constant dense<0.000000e+00> : vector<8x128xf32>
      %31 = tpu.matmul %29, %30, %cst_28 {dimension_numbers = #tpu.dot_dimension_numbers<[1], [0], [0], [1], [0, 0, 1, 1], [], []>} : vector<8x128xf32>, vector<128x128xf32>, vector<8x128xf32> -> vector<8x128xf32>
      %c0_29 = arith.constant 0 : index
      %c0_30 = arith.constant 0 : index
      %32 = vector.load %arg9[%c0_29, %c0_30] : memref<1x128xf32, #tpu.memory_space<vmem>>, vector<1x128xf32>
      %33 = vector.broadcast %32 : vector<1x128xf32> to vector<8x128xf32>
      %34 = arith.addf %31, %33 : vector<8x128xf32>
      %c0_31 = arith.constant 0 : index
      %c0_32 = arith.constant 0 : index
      %35 = vector.load %arg10[%c0_31, %c0_32] : memref<8x128xf32, #tpu.memory_space<vmem>>, vector<8x128xf32>
      tpu.vector_store %arg10[%c0_31, %c0_32], %34 {strides = array<i32>} : memref<8x128xf32, #tpu.memory_space<vmem>>, vector<8x128xf32>,
    } else {
    }
    return
  }
  func.func @transform_0(%arg0: i32, %arg1: i32) -> (i32, i32, i32) {
    %c0_i32 = arith.constant 0 : i32
    %c0_i32_0 = arith.constant 0 : i32
    return %arg0, %arg1, %c0_i32 : i32, i32, i32
  }
  func.func @transform_1(%arg0: i32, %arg1: i32) -> (i32, i32, i32) {
    %c0_i32 = arith.constant 0 : i32
    %c0_i32_0 = arith.constant 0 : i32
    return %arg0, %arg1, %c0_i32 : i32, i32, i32
  }
  func.func @transform_2(%arg0: i32, %arg1: i32) -> (i32, i32) {
    %c0_i32 = arith.constant 0 : i32
    %c0_i32_0 = arith.constant 0 : i32
    %c0_i32_1 = arith.constant 0 : i32
    return %c0_i32, %c0_i32_0 : i32, i32
  }
  func.func @transform_3(%arg0: i32, %arg1: i32) -> (i32, i32) {
    %c0_i32 = arith.constant 0 : i32
    %c0_i32_0 = arith.constant 0 : i32
    %c0_i32_1 = arith.constant 0 : i32
    return %c0_i32, %c0_i32_0 : i32, i32
  }
  func.func @transform_4(%arg0: i32, %arg1: i32) -> (i32, i32) {
    %c0_i32 = arith.constant 0 : i32
    %c0_i32_0 = arith.constant 0 : i32
    %c0_i32_1 = arith.constant 0 : i32
    return %c0_i32, %c0_i32_0 : i32, i32
  }
  func.func @transform_5(%arg0: i32, %arg1: i32) -> (i32, i32) {
    %c0_i32 = arith.constant 0 : i32
    %c0_i32_0 = arith.constant 0 : i32
    %c0_i32_1 = arith.constant 0 : i32
    return %c0_i32, %c0_i32_0 : i32, i32
  }
  func.func @transform_6(%arg0: i32, %arg1: i32) -> (i32, i32) {
    %c0_i32 = arith.constant 0 : i32
    %c0_i32_0 = arith.constant 0 : i32
    %c0_i32_1 = arith.constant 0 : i32
    return %c0_i32, %c0_i32_0 : i32, i32
  }
  func.func @transform_7(%arg0: i32, %arg1: i32) -> (i32, i32) {
    %c0_i32 = arith.constant 0 : i32
    %c0_i32_0 = arith.constant 0 : i32
    %c0_i32_1 = arith.constant 0 : i32
    return %c0_i32, %c0_i32_0 : i32, i32
  }
  func.func @transform_8(%arg0: i32, %arg1: i32) -> (i32, i32) {
    %c0_i32 = arith.constant 0 : i32
    %c0_i32_0 = arith.constant 0 : i32
    return %arg0, %c0_i32 : i32, i32
  }
}

</mosaic_0001>

<bundles_post_ra>
// kernel: tpu_custom_call.1
= control target key start
LH: loop header
LB: loop body
LE: loop exit
PB: predicated region body
PF: predicated region fallthrough
CT: control target
= control target key end

     0   :  { %13 = vsyncpa [#allocation4], 0  ;;  %s5631_s0 = inlined_call_operand.vmem [shape: bf16[16,200,32], index: 0, kind: input, shape index: {}]   ;;  %s5632_s1 = inlined_call_operand.vmem [shape: f32[16,200,1], index: 1, kind: input, shape index: {}]   ;;  %s5633_s2 = inlined_call_operand.vmem [shape: f32[32,128], index: 2, kind: input, shape index: {}]   ;;  %s5634_s3 = inlined_call_operand.vmem [shape: f32[1,128], index: 3, kind: input, shape index: {}]   ;;  %s5635_s4 = inlined_call_operand.vmem [shape: f32[128,128], index: 4, kind: input, shape index: {}]   ;;  %s5636_s5 = inlined_call_operand.vmem [shape: f32[1,128], index: 5, kind: input, shape index: {}]   ;;  %s5637_s6 = inlined_call_operand.vmem [shape: f32[128,128], index: 6, kind: input, shape index: {}]   ;;  %s5638_s7 = inlined_call_operand.vmem [shape: f32[1,128], index: 7, kind: input, shape index: {}]   ;;  %s5639_s8 = inlined_call_operand.hbm [shape: f32[16,128], index: 8, kind: output, shape index: {}]  }
   0x1   :  { %15 = vsyncpa [#allocation4 + $0x1], 0  ;;  %s3921_s27 = smov 0   ;;  %s3923_s28 = smov 0  }
   0x2   :  { %s3925_s29 = smov 0   ;;  %s3927_s30 = smov 0  }
   0x3   :  { %s3929_s9 = smov 0   ;;  %s3931_s10 = smov 0  }
   0x4 LB: > { %s3033_s11 = sadd.s32 4294967295, %s3869_s10   ;;  %s3034_s12 = sadd.s32 4294967294, %s3869_s10   ;;  %s3869_s10 = sphi %s3931_s10, %s21_s10   ;;  %s3865_s9 = sphi %s3929_s9, %s5964_s9   ;;  %s3861_s30 = sphi %s3927_s30, %s5963_s30   ;;  %s3857_s29 = sphi %s3925_s29, %s5962_s29   ;;  %s3853_s28 = sphi %s3923_s28, %s5961_s28   ;;  %s3849_s27 = sphi %s3921_s27, %s5960_s27  }
   0x5   : > { %s33_s13 = sadd.s32 1, %s3865_s9  ;;  %s222_s14 = sadd.s32 1, %s3857_s29 }
   0x6   : > { %p35_p0 = scmp.ge.s32.totalorder %s33_s13, 2  ;;  %p232_p1 = scmp.ne.s32.totalorder %s3857_s29, %s3853_s28 }
   0x7   : > { %p233_p2 = scmp.eq.s32.totalorder %s3033_s11, 1  ;;  %p238_p3 = scmp.ne.s32.totalorder %s3853_s28, %s3849_s27 }
   0x8   : > { %s5966_s13 = smov (%p35_p0, %s33_s13), 0  ;;  %p239_p5 = scmp.eq.s32.totalorder %s3034_s12, 1 }
   0x9   : > { %p3961_p4 = por %p233_p2, %p232_p1  ;;  %s219_s16 = ssub.s32 %s3865_s9, %s5966_s13 }
   0xa   : > { %p3037_p6 = scmp.ge.s32.totalorder %s3869_s10, 1  ;;  %p220_p7 = scmp.eq.s32.totalorder %s219_s16, 0 }
   0xb   : > { %p3968_p8 = por %p239_p5, %p238_p3  ;;  %p305_p9 = scmp.lt.s32.totalorder %s3869_s10, 3 }
   0xc   : > { %s3974_s18 = scalar_select %p220_p7, %s3857_s29, %s222_s14  }
   0xd   : > { %p306_p10 = pnand %p3037_p6, %p305_p9 }
   0xf   : > { %309 = sbr.rel (%p306_p10) target bundleno = 1253 (0x4e5), region = 52 }
  0x16   : > { %s3039_s19 = sshll.u32 %s3861_s30, 3  ;;  %v3871_v0 = vmov 0   ;;  %vm382_vm0 = vcmask 261120   ;;  %vm3874_vm1 = vmmov 0   ;;  %vm2634_vm2 = vcmask 1041409   ;;  %s351_s22 = sand.u32 1, %s3853_s28  }
  0x17   : > { %3786 = vset.pattern.permute.xlu1 %v3871_v0  ;;  %3785 = vset.pattern.permute.xlu0 %v3871_v0  ;;  %p356_p11 = scmp.lt.s32.totalorder %s3039_s19, 15  ;;  %vm2636_vm3 = vcmask 1042434   ;;  %vm2638_vm4 = vcmask 1043459   ;;  %vm2640_vm5 = vcmask 1044484   ;;  %vm2642_vm6 = vcmask 1045509   ;;  %s3048_s26 = sshll.u32 %s3861_s30, 7 }
  0x18   : > { %vm2644_vm7 = vcmask 1046534   ;;  %vm2646_vm8 = vcmask 1047559   ;;  %s3875_s30 = smov [#allocation3]  }
  0x19   : > { %s5968_s19 = smov (!%p356_p11, %s3039_s19), 15 }
  0x1a   : > { %s3725_s20 = smul.u32 200, %s5968_s19 }
  0x1b   : > { %s3724_s24 = smul.u32 100, %s5968_s19  ;;  %s5584_s19 = scalar_lea.hbm %s5639_s8, %s3048_s26 }
  0x1c   : > { %s3983_s23 = scalar_lea.vmem %s5632_s1, %s3725_s20  ;;  %s2929_s20 = scalar_lea.sflag [#allocation4], %s351_s22 }
  0x1d   : > { %v609_v1 = vld [vmem:[%s3983_s23 + $0xc8] sm:$0xff]  ;;  %v584_v2 = vld [vmem:[%s3983_s23] sm:$0xff]  ;;  %v610_v3 = vld [vmem:[%s3983_s23 + $0xd0] sm:$0xff]  ;;  %s4211_s11 = scalar_lea.vmem %s5631_s0, %s3724_s24 }
  0x1e   : > { %1112 = vperm.xlu1 %3786, %v609_v1   ;;  %987 = vperm.xlu0 %3785, %v584_v2   ;;  %v585_v4 = vld [vmem:[%s3983_s23 + $0x8] sm:$0xff]  ;;  %v635_v5 = vld [vmem:[%s3983_s23 + $0x198] sm:$0xff]  ;;  %v634_v6 = vld [vmem:[%s3983_s23 + $0x190] sm:$0xff] }
  0x1f   : > { %v611_v7 = vld [vmem:[%s3983_s23 + $0xd8] sm:$0xff]  ;;  %v586_v8 = vld [vmem:[%s3983_s23 + $0x10] sm:$0xff]  ;;  %v660_v9 = vld [vmem:[%s3983_s23 + $0x260] sm:$0xff] }
  0x20   : > { %v659_v10 = vld [vmem:[%s3983_s23 + $0x258] sm:$0xff]  ;;  %v684_v11 = vld [vmem:[%s3983_s23 + $0x320] sm:$0xff]  ;;  %v685_v14 = vld [vmem:[%s3983_s23 + $0x328] sm:$0xff] }
  0x21   : > { %v636_v12 = vld [vmem:[%s3983_s23 + $0x1a0] sm:$0xff]  ;;  %v587_v13 = vld [vmem:[%s3983_s23 + $0x18] sm:$0xff]  ;;  %v661_v15 = vld [vmem:[%s3983_s23 + $0x268] sm:$0xff] }
  0x22   : > { %1117 = vperm.xlu1 %3786, %v610_v3   ;;  %992 = vperm.xlu0 %3785, %v585_v4   ;;  %v612_v16 = vld [vmem:[%s3983_s23 + $0xe0] sm:$0xff]  ;;  %v710_v17 = vld [vmem:[%s3983_s23 + $0x3f0] sm:$0xff]  ;;  %v709_v18 = vld [vmem:[%s3983_s23 + $0x3e8] sm:$0xff] }
  0x23   : > { %v686_v19 = vld [vmem:[%s3983_s23 + $0x330] sm:$0xff]  ;;  %v637_v20 = vld [vmem:[%s3983_s23 + $0x1a8] sm:$0xff]  ;;  %v735_v21 = vld [vmem:[%s3983_s23 + $0x4b8] sm:$0xff] }
  0x24   : > { %v734_v22 = vld [vmem:[%s3983_s23 + $0x4b0] sm:$0xff]  ;;  %v613_v23 = vld [vmem:[%s3983_s23 + $0xe8] sm:$0xff]  ;;  %v588_v24 = vld [vmem:[%s3983_s23 + $0x20] sm:$0xff] }
  0x25   : > { %v711_v25 = vld [vmem:[%s3983_s23 + $0x3f8] sm:$0xff]  ;;  %v662_v26 = vld [vmem:[%s3983_s23 + $0x270] sm:$0xff]  ;;  %v760_v27 = vld [vmem:[%s3983_s23 + $0x580] sm:$0xff] }
  0x26   : > { %1242 = vperm.xlu1 %3786, %v635_v5   ;;  %1237 = vperm.xlu0 %3785, %v634_v6   ;;  %v759_v28 = vld [vmem:[%s3983_s23 + $0x578] sm:$0xff]  ;;  %v638_v30 = vld [vmem:[%s3983_s23 + $0x1b0] sm:$0xff]  ;;  %v589_v31 = vld [vmem:[%s3983_s23 + $0x28] sm:$0xff] }
  0x27   : > { %v687_v29 = vld [vmem:[%s3983_s23 + $0x338] sm:$0xff]  ;;  %v736_v32 = vld [vmem:[%s3983_s23 + $0x4c0] sm:$0xff]  ;;  %v614_v34 = vld [vmem:[%s3983_s23 + $0xf0] sm:$0xff] }
  0x28   : > { %v663_v33 = vld [vmem:[%s3983_s23 + $0x278] sm:$0xff]  ;;  %v761_v35 = vld [vmem:[%s3983_s23 + $0x588] sm:$0xff]  ;;  %v712_v36 = vld [vmem:[%s3983_s23 + $0x400] sm:$0xff] }
  0x29   : > { %v688_v37 = vld [vmem:[%s3983_s23 + $0x340] sm:$0xff]  ;;  %v639_v38 = vld [vmem:[%s3983_s23 + $0x1b8] sm:$0xff]  ;;  %v590_v39 = vld [vmem:[%s3983_s23 + $0x30] sm:$0xff] }
  0x2a   : > { %1122 = vperm.xlu1 %3786, %v611_v7   ;;  %997 = vperm.xlu0 %3785, %v586_v8   ;;  %v737_v40 = vld [vmem:[%s3983_s23 + $0x4c8] sm:$0xff]  ;;  %v664_v41 = vld [vmem:[%s3983_s23 + $0x280] sm:$0xff]  ;;  %v615_v42 = vld [vmem:[%s3983_s23 + $0xf8] sm:$0xff] }
  0x2b   : > { %v762_v43 = vld [vmem:[%s3983_s23 + $0x590] sm:$0xff]  ;;  %v713_v44 = vld [vmem:[%s3983_s23 + $0x408] sm:$0xff]  ;;  %v640_v46 = vld [vmem:[%s3983_s23 + $0x1c0] sm:$0xff] }
  0x2c   : > { %v689_v45 = vld [vmem:[%s3983_s23 + $0x348] sm:$0xff]  ;;  %v591_v47 = vld [vmem:[%s3983_s23 + $0x38] sm:$0xff]  ;;  %v738_v48 = vld [vmem:[%s3983_s23 + $0x4d0] sm:$0xff] }
  0x2d   : > { %v665_v49 = vld [vmem:[%s3983_s23 + $0x288] sm:$0xff]  ;;  %v616_v50 = vld [vmem:[%s3983_s23 + $0x100] sm:$0xff]  ;;  %v763_v51 = vld [vmem:[%s3983_s23 + $0x598] sm:$0xff] }
  0x2e   : > { %1367 = vperm.xlu1 %3786, %v660_v9   ;;  %1362 = vperm.xlu0 %3785, %v659_v10   ;;  %v714_v52 = vld [vmem:[%s3983_s23 + $0x410] sm:$0xff]  ;;  %v641_v54 = vld [vmem:[%s3983_s23 + $0x1c8] sm:$0xff]  ;;  %v592_v55 = vld [vmem:[%s3983_s23 + $0x40] sm:$0xff] }
  0x2f   : > { %v690_v53 = vld [vmem:[%s3983_s23 + $0x350] sm:$0xff]  ;;  %v739_v56 = vld [vmem:[%s3983_s23 + $0x4d8] sm:$0xff]  ;;  %v617_v58 = vld [vmem:[%s3983_s23 + $0x108] sm:$0xff] }
  0x30   : > { %v666_v57 = vld [vmem:[%s3983_s23 + $0x290] sm:$0xff]  ;;  %v764_v59 = vld [vmem:[%s3983_s23 + $0x5a0] sm:$0xff]  ;;  %v715_v60 = vld [vmem:[%s3983_s23 + $0x418] sm:$0xff] }
  0x31   : > { %v691_v61 = vld [vmem:[%s3983_s23 + $0x358] sm:$0xff]  ;;  %v642_v62 = vld [vmem:[%s3983_s23 + $0x1d0] sm:$0xff]  ;;  %v593_v63 = vld [vmem:[%s3983_s23 + $0x48] sm:$0xff] }
  0x32   : > { %1487 = vperm.xlu1 %3786, %v684_v11   ;;  %1247 = vperm.xlu0 %3785, %v636_v12   ;;  %v740_v0 = vld [vmem:[%s3983_s23 + $0x4e0] sm:$0xff]  ;;  %v667_v1 = vld [vmem:[%s3983_s23 + $0x298] sm:$0xff]  ;;  %v618_v2 = vld [vmem:[%s3983_s23 + $0x110] sm:$0xff] }
  0x33   : > { %v765_v5 = vld [vmem:[%s3983_s23 + $0x5a8] sm:$0xff]  ;;  %v716_v6 = vld [vmem:[%s3983_s23 + $0x420] sm:$0xff]  ;;  %v643_v10 = vld [vmem:[%s3983_s23 + $0x1d8] sm:$0xff] }
  0x34   : > { %v692_v9 = vld [vmem:[%s3983_s23 + $0x360] sm:$0xff] }
  0x36   : > { %1002 = vperm.xlu1 %3786, %v587_v13   ;;  %1492 = vperm.xlu0 %3785, %v685_v14   ;;  %v594_v13 = vld [vmem:[%s3983_s23 + $0x50] sm:$0xff]  ;;  %v741_v14 = vld [vmem:[%s3983_s23 + $0x4e8] sm:$0xff] }
  0x3a   : > { %1372 = vperm.xlu1 %3786, %v661_v15   ;;  %1127 = vperm.xlu0 %3785, %v612_v16  }
  0x3e   : > { %1617 = vperm.xlu1 %3786, %v710_v17   ;;  %1612 = vperm.xlu0 %3785, %v709_v18   ;;  %v668_v17 = vld [vmem:[%s3983_s23 + $0x2a0] sm:$0xff]  ;;  %v619_v18 = vld [vmem:[%s3983_s23 + $0x118] sm:$0xff] }
  0x42   : > { %1497 = vperm.xlu1 %3786, %v686_v19   ;;  %1252 = vperm.xlu0 %3785, %v637_v20  }
  0x46   : > { %1742 = vperm.xlu1 %3786, %v735_v21   ;;  %1737 = vperm.xlu0 %3785, %v734_v22   ;;  %v766_v21 = vld [vmem:[%s3983_s23 + $0x5b0] sm:$0xff]  ;;  %v717_v22 = vld [vmem:[%s3983_s23 + $0x428] sm:$0xff] }
  0x4a   : > { %1132 = vperm.xlu1 %3786, %v613_v23   ;;  %1007 = vperm.xlu0 %3785, %v588_v24  }
  0x4e   : > { %1622 = vperm.xlu1 %3786, %v711_v25   ;;  %1377 = vperm.xlu0 %3785, %v662_v26   ;;  %v693_v25 = vld [vmem:[%s3983_s23 + $0x368] sm:$0xff]  ;;  %v644_v26 = vld [vmem:[%s3983_s23 + $0x1e0] sm:$0xff] }
  0x52   : > { %1867 = vperm.xlu1 %3786, %v760_v27   ;;  %1862 = vperm.xlu0 %3785, %v759_v28  }
  0x56   : > { %1502 = vperm.xlu1 %3786, %v687_v29   ;;  %1257 = vperm.xlu0 %3785, %v638_v30   ;;  %v595_v29 = vld [vmem:[%s3983_s23 + $0x58] sm:$0xff]  ;;  %v742_v30 = vld [vmem:[%s3983_s23 + $0x4f0] sm:$0xff] }
  0x5a   : > { %1012 = vperm.xlu1 %3786, %v589_v31   ;;  %1747 = vperm.xlu0 %3785, %v736_v32  }
  0x5e   : > { %1382 = vperm.xlu1 %3786, %v663_v33   ;;  %1137 = vperm.xlu0 %3785, %v614_v34   ;;  %v669_v33 = vld [vmem:[%s3983_s23 + $0x2a8] sm:$0xff]  ;;  %v620_v34 = vld [vmem:[%s3983_s23 + $0x120] sm:$0xff] }
  0x62   : > { %1872 = vperm.xlu1 %3786, %v761_v35   ;;  %1627 = vperm.xlu0 %3785, %v712_v36  }
  0x66   : > { %1507 = vperm.xlu1 %3786, %v688_v37   ;;  %1262 = vperm.xlu0 %3785, %v639_v38   ;;  %v767_v37 = vld [vmem:[%s3983_s23 + $0x5b8] sm:$0xff]  ;;  %v718_v38 = vld [vmem:[%s3983_s23 + $0x430] sm:$0xff] }
  0x6a   : > { %1017 = vperm.xlu1 %3786, %v590_v39   ;;  %1752 = vperm.xlu0 %3785, %v737_v40  }
  0x6e   : > { %1387 = vperm.xlu1 %3786, %v664_v41   ;;  %1142 = vperm.xlu0 %3785, %v615_v42   ;;  %v694_v41 = vld [vmem:[%s3983_s23 + $0x370] sm:$0xff]  ;;  %v645_v42 = vld [vmem:[%s3983_s23 + $0x1e8] sm:$0xff] }
  0x72   : > { %1877 = vperm.xlu1 %3786, %v762_v43   ;;  %1632 = vperm.xlu0 %3785, %v713_v44  }
  0x76   : > { %1512 = vperm.xlu1 %3786, %v689_v45   ;;  %1267 = vperm.xlu0 %3785, %v640_v46   ;;  %v596_v45 = vld [vmem:[%s3983_s23 + $0x60] sm:$0xff]  ;;  %v743_v46 = vld [vmem:[%s3983_s23 + $0x4f8] sm:$0xff] }
  0x7a   : > { %1022 = vperm.xlu1 %3786, %v591_v47   ;;  %1757 = vperm.xlu0 %3785, %v738_v48  }
  0x7e   : > { %1392 = vperm.xlu1 %3786, %v665_v49   ;;  %1147 = vperm.xlu0 %3785, %v616_v50   ;;  %v670_v49 = vld [vmem:[%s3983_s23 + $0x2b0] sm:$0xff]  ;;  %v621_v50 = vld [vmem:[%s3983_s23 + $0x128] sm:$0xff] }
  0x82   : > { %1882 = vperm.xlu1 %3786, %v763_v51   ;;  %1637 = vperm.xlu0 %3785, %v714_v52  }
  0x86   : > { %1517 = vperm.xlu1 %3786, %v690_v53   ;;  %1272 = vperm.xlu0 %3785, %v641_v54   ;;  %v768_v53 = vld [vmem:[%s3983_s23 + $0x5c0] sm:$0xff]  ;;  %v719_v54 = vld [vmem:[%s3983_s23 + $0x438] sm:$0xff] }
  0x8a   : > { %1027 = vperm.xlu1 %3786, %v592_v55   ;;  %1762 = vperm.xlu0 %3785, %v739_v56  }
  0x8e   : > { %1397 = vperm.xlu1 %3786, %v666_v57   ;;  %1152 = vperm.xlu0 %3785, %v617_v58   ;;  %v695_v57 = vld [vmem:[%s3983_s23 + $0x378] sm:$0xff]  ;;  %v646_v58 = vld [vmem:[%s3983_s23 + $0x1f0] sm:$0xff] }
  0x92   : > { %1887 = vperm.xlu1 %3786, %v764_v59   ;;  %1642 = vperm.xlu0 %3785, %v715_v60  }
  0x96   : > { %1522 = vperm.xlu1 %3786, %v691_v61   ;;  %1277 = vperm.xlu0 %3785, %v642_v62   ;;  %v597_v61 = vld [vmem:[%s3983_s23 + $0x68] sm:$0xff]  ;;  %v744_v62 = vld [vmem:[%s3983_s23 + $0x500] sm:$0xff] }
  0x9a   : > { %1032 = vperm.xlu1 %3786, %v593_v63   ;;  %1767 = vperm.xlu0 %3785, %v740_v0  }
  0x9d   : > { %v4051_v3 = vpop.permute.xlu1 %1112  ;;  %v4053_v4 = vpop.permute.xlu0 %987 }
  0x9e   : > { %1402 = vperm.xlu1 %3786, %v667_v1   ;;  %1157 = vperm.xlu0 %3785, %v618_v2   ;;  %v671_v1 = vld [vmem:[%s3983_s23 + $0x2b8] sm:$0xff]  ;;  %v622_v2 = vld [vmem:[%s3983_s23 + $0x130] sm:$0xff] }
  0xa1   : > { %v4057_v7 = vpop.permute.xlu1 %1117  ;;  %v4059_v8 = vpop.permute.xlu0 %992 }
  0xa2   : > { %1892 = vperm.xlu1 %3786, %v765_v5   ;;  %1647 = vperm.xlu0 %3785, %v716_v6  }
  0xa5   : > { %v4063_v11 = vpop.permute.xlu1 %1242  ;;  %v4065_v12 = vpop.permute.xlu0 %1237 }
  0xa6   : > { %1527 = vperm.xlu1 %3786, %v692_v9   ;;  %1282 = vperm.xlu0 %3785, %v643_v10   ;;  %v769_v9 = vld [vmem:[%s3983_s23 + $0x5c8] sm:$0xff]  ;;  %v720_v10 = vld [vmem:[%s3983_s23 + $0x440] sm:$0xff] }
  0xa9   : > { %v4069_v15 = vpop.permute.xlu1 %1122  ;;  %v4071_v16 = vpop.permute.xlu0 %997 }
  0xaa   : > { %1037 = vperm.xlu1 %3786, %v594_v13   ;;  %1772 = vperm.xlu0 %3785, %v741_v14  }
  0xad   : > { %v4075_v19 = vpop.permute.xlu1 %1367  ;;  %v4077_v20 = vpop.permute.xlu0 %1362 }
  0xae   : > { %1407 = vperm.xlu1 %3786, %v668_v17   ;;  %1162 = vperm.xlu0 %3785, %v619_v18   ;;  %v696_v17 = vld [vmem:[%s3983_s23 + $0x380] sm:$0xff]  ;;  %v647_v18 = vld [vmem:[%s3983_s23 + $0x1f8] sm:$0xff] }
  0xb1   : > { %v4081_v23 = vpop.permute.xlu1 %1487  ;;  %v4083_v24 = vpop.permute.xlu0 %1247 }
  0xb2   : > { %1897 = vperm.xlu1 %3786, %v766_v21   ;;  %1652 = vperm.xlu0 %3785, %v717_v22  }
  0xb5   : > { %v4087_v27 = vpop.permute.xlu1 %1002  ;;  %v4089_v28 = vpop.permute.xlu0 %1492 }
  0xb6   : > { %1532 = vperm.xlu1 %3786, %v693_v25   ;;  %1287 = vperm.xlu0 %3785, %v644_v26   ;;  %v598_v25 = vld [vmem:[%s3983_s23 + $0x70] sm:$0xff]  ;;  %v745_v26 = vld [vmem:[%s3983_s23 + $0x508] sm:$0xff] }
  0xb9   : > { %v4093_v31 = vpop.permute.xlu1 %1372  ;;  %v4095_v32 = vpop.permute.xlu0 %1127 }
  0xba   : > { %1042 = vperm.xlu1 %3786, %v595_v29   ;;  %1777 = vperm.xlu0 %3785, %v742_v30  }
  0xbd   : > { %v4099_v35 = vpop.permute.xlu1 %1617  ;;  %v4101_v36 = vpop.permute.xlu0 %1612 }
  0xbe   : > { %1412 = vperm.xlu1 %3786, %v669_v33   ;;  %1167 = vperm.xlu0 %3785, %v620_v34   ;;  %v672_v33 = vld [vmem:[%s3983_s23 + $0x2c0] sm:$0xff]  ;;  %v623_v34 = vld [vmem:[%s3983_s23 + $0x138] sm:$0xff] }
  0xc1   : > { %v4105_v39 = vpop.permute.xlu1 %1497  ;;  %v4107_v40 = vpop.permute.xlu0 %1252 }
  0xc2   : > { %1902 = vperm.xlu1 %3786, %v767_v37   ;;  %1657 = vperm.xlu0 %3785, %v718_v38  }
  0xc5   : > { %v4111_v43 = vpop.permute.xlu1 %1742  ;;  %v4113_v44 = vpop.permute.xlu0 %1737 }
  0xc6   : > { %1537 = vperm.xlu1 %3786, %v694_v41   ;;  %1292 = vperm.xlu0 %3785, %v645_v42   ;;  %v770_v41 = vld [vmem:[%s3983_s23 + $0x5d0] sm:$0xff]  ;;  %v721_v42 = vld [vmem:[%s3983_s23 + $0x448] sm:$0xff] }
  0xc9   : > { %v4117_v47 = vpop.permute.xlu1 %1132  ;;  %v4119_v48 = vpop.permute.xlu0 %1007 }
  0xca   : > { %1047 = vperm.xlu1 %3786, %v596_v45   ;;  %1782 = vperm.xlu0 %3785, %v743_v46  }
  0xcd   : > { %v4123_v51 = vpop.permute.xlu1 %1622  ;;  %v4125_v52 = vpop.permute.xlu0 %1377 }
  0xce   : > { %1417 = vperm.xlu1 %3786, %v670_v49   ;;  %1172 = vperm.xlu0 %3785, %v621_v50   ;;  %v697_v49 = vld [vmem:[%s3983_s23 + $0x388] sm:$0xff]  ;;  %v648_v50 = vld [vmem:[%s3983_s23 + $0x200] sm:$0xff] }
  0xd1   : > { %v4129_v55 = vpop.permute.xlu1 %1867  ;;  %v4131_v56 = vpop.permute.xlu0 %1862 }
  0xd2   : > { %5697 = vst [vmem:[#allocation6_spill] sm:$0xff] %v4131_v56  ;;  %1907 = vperm.xlu1 %3786, %v768_v53   ;;  %1662 = vperm.xlu0 %3785, %v719_v54   ;;  %v4362_v56 = vld [vmem:[%s4211_s11 + $0x80] sm:$0xff]  }
  0xd3   : > { %5741 = vst [vmem:[#allocation50_spill] sm:$0xff] %v4362_v56 }
  0xd5   : > { %v4135_v59 = vpop.permute.xlu1 %1502  ;;  %v4137_v60 = vpop.permute.xlu0 %1257 }
  0xd6   : > { %5698 = vst [vmem:[#allocation7_spill] sm:$0xff] %v4135_v59  ;;  %5699 = vst [vmem:[#allocation8_spill] sm:$0xff] %v4137_v60  ;;  %1542 = vperm.xlu1 %3786, %v695_v57   ;;  %1297 = vperm.xlu0 %3785, %v646_v58   ;;  %v599_v57 = vld [vmem:[%s3983_s23 + $0x78] sm:$0xff]  ;;  %v746_v58 = vld [vmem:[%s3983_s23 + $0x510] sm:$0xff] }
  0xd7   : > { %v4376_v60 = vld [vmem:[%s4211_s11 + $0x1a8] sm:$0xff]  }
  0xd8   : > { %v601_v59 = vld [vmem:[%s3983_s23 + $0x88] sm:$0xff] }
  0xd9   : > { %v4141_v63 = vpop.permute.xlu1 %1012  ;;  %v4143_v0 = vpop.permute.xlu0 %1747 }
  0xda   : > { %5700 = vst [vmem:[#allocation9_spill] sm:$0xff] %v4141_v63  ;;  %5701 = vst [vmem:[#allocation10_spill] sm:$0xff] %v4143_v0  ;;  %1052 = vperm.xlu1 %3786, %v597_v61   ;;  %1787 = vperm.xlu0 %3785, %v744_v62   ;;  %v4336_v0 = vld [vmem:[%s4211_s11 + $0x140] sm:$0xff]   ;;  %v650_v63 = vld [vmem:[%s3983_s23 + $0x210] sm:$0xff] }
  0xdb   : > { %5737 = vst [vmem:[#allocation46_spill] sm:$0xff] %v4336_v0 }
  0xdd   : > { %v4147_v5 = vpop.permute.xlu1 %1382  ;;  %v4149_v6 = vpop.permute.xlu0 %1137 }
  0xde   : > { %5702 = vst [vmem:[#allocation11_spill] sm:$0xff] %v4147_v5  ;;  %5703 = vst [vmem:[#allocation12_spill] sm:$0xff] %v4149_v6  ;;  %1422 = vperm.xlu1 %3786, %v671_v1   ;;  %1177 = vperm.xlu0 %3785, %v622_v2   ;;  %v673_v1 = vld [vmem:[%s3983_s23 + $0x2c8] sm:$0xff]  ;;  %v624_v2 = vld [vmem:[%s3983_s23 + $0x140] sm:$0xff] }
  0xdf   : > { %v4333_v5 = vld [vmem:[%s4211_s11 + $0x18] sm:$0xff]  }
  0xe0   : > { %5736 = vst [vmem:[#allocation45_spill] sm:$0xff] %v4333_v5  ;;  %v626_v5 = vld [vmem:[%s3983_s23 + $0x150] sm:$0xff] }
  0xe1   : > { %v4153_v13 = vpop.permute.xlu1 %1872  ;;  %v4155_v14 = vpop.permute.xlu0 %1627 }
  0xe2   : > { %5704 = vst [vmem:[#allocation13_spill] sm:$0xff] %v4153_v13  ;;  %5705 = vst [vmem:[#allocation14_spill] sm:$0xff] %v4155_v14  ;;  %1912 = vperm.xlu1 %3786, %v769_v9   ;;  %1667 = vperm.xlu0 %3785, %v720_v10   ;;  %v4343_v14 = vld [vmem:[%s4211_s11 + $0x2c8] sm:$0xff]  }
  0xe3   : > { %5738 = vst [vmem:[#allocation47_spill] sm:$0xff] %v4343_v14 }
  0xe5   : > { %v4159_v21 = vpop.permute.xlu1 %1507  ;;  %v4161_v22 = vpop.permute.xlu0 %1262 }
  0xe6   : > { %5706 = vst [vmem:[#allocation15_spill] sm:$0xff] %v4159_v21  ;;  %5707 = vst [vmem:[#allocation16_spill] sm:$0xff] %v4161_v22  ;;  %1547 = vperm.xlu1 %3786, %v696_v17   ;;  %1302 = vperm.xlu0 %3785, %v647_v18   ;;  %v771_v17 = vld [vmem:[%s3983_s23 + $0x5d8] sm:$0xff]  ;;  %v722_v18 = vld [vmem:[%s3983_s23 + $0x450] sm:$0xff] }
  0xe7   : > { %v4316_v21 = vld [vmem:[%s4211_s11 + $0x78] sm:$0xff]   ;;  %v4330_v22 = vld [vmem:[%s4211_s11 + $0x1a0] sm:$0xff]  }
  0xe8   : > { %5732 = vst [vmem:[#allocation41_spill] sm:$0xff] %v4316_v21  ;;  %v4386_v21 = vld [vmem:[%s4211_s11 + $0x148] sm:$0xff]  }
  0xe9   : > { %v4165_v29 = vpop.permute.xlu1 %1017  ;;  %v4167_v30 = vpop.permute.xlu0 %1752 }
  0xea   : > { %5708 = vst [vmem:[#allocation17_spill] sm:$0xff] %v4165_v29  ;;  %5709 = vst [vmem:[#allocation18_spill] sm:$0xff] %v4167_v30  ;;  %1057 = vperm.xlu1 %3786, %v598_v25   ;;  %1792 = vperm.xlu0 %3785, %v745_v26   ;;  %v4290_v30 = vld [vmem:[%s4211_s11 + $0x2c0] sm:$0xff]   ;;  %v723_v29 = vld [vmem:[%s3983_s23 + $0x458] sm:$0xff] }
  0xeb   : > { %5728 = vst [vmem:[#allocation37_spill] sm:$0xff] %v4290_v30 }
  0xed   : > { %v4171_v37 = vpop.permute.xlu1 %1387  ;;  %v4173_v38 = vpop.permute.xlu0 %1142 }
  0xee   : > { %5710 = vst [vmem:[#allocation19_spill] sm:$0xff] %v4171_v37  ;;  %5711 = vst [vmem:[#allocation20_spill] sm:$0xff] %v4173_v38  ;;  %1427 = vperm.xlu1 %3786, %v672_v33   ;;  %1182 = vperm.xlu0 %3785, %v623_v34   ;;  %v698_v33 = vld [vmem:[%s3983_s23 + $0x390] sm:$0xff]  ;;  %v649_v34 = vld [vmem:[%s3983_s23 + $0x208] sm:$0xff] }
  0xef   : > { %v4284_v38 = vld [vmem:[%s4211_s11 + $0x10] sm:$0xff]   ;;  %v4287_v37 = vld [vmem:[%s4211_s11 + $0x138] sm:$0xff]  }
  0xf1   : > { %v4177_v45 = vpop.permute.xlu1 %1877  ;;  %v4179_v46 = vpop.permute.xlu0 %1632 }
  0xf2   : > { %5712 = vst [vmem:[#allocation21_spill] sm:$0xff] %v4177_v45  ;;  %5713 = vst [vmem:[#allocation22_spill] sm:$0xff] %v4179_v46  ;;  %1917 = vperm.xlu1 %3786, %v770_v41   ;;  %1672 = vperm.xlu0 %3785, %v721_v42  }
  0xf5   : > { %v4183_v53 = vpop.permute.xlu1 %1512  ;;  %v4185_v54 = vpop.permute.xlu0 %1267 }
  0xf6   : > { %5714 = vst [vmem:[#allocation23_spill] sm:$0xff] %v4183_v53  ;;  %5715 = vst [vmem:[#allocation24_spill] sm:$0xff] %v4185_v54  ;;  %1552 = vperm.xlu1 %3786, %v697_v49   ;;  %1307 = vperm.xlu0 %3785, %v648_v50   ;;  %v600_v49 = vld [vmem:[%s3983_s23 + $0x80] sm:$0xff]  ;;  %v747_v50 = vld [vmem:[%s3983_s23 + $0x518] sm:$0xff] }
  0xf7   : > { %v4273_v53 = vld [vmem:[%s4211_s11 + $0x258] sm:$0xff]   ;;  %v4309_v54 = vld [vmem:[%s4211_s11 + $0x260] sm:$0xff]  }
  0xf8   : > { %5731 = vst [vmem:[#allocation40_spill] sm:$0xff] %v4309_v54  ;;  %v4379_v54 = vld [vmem:[%s4211_s11 + $0x20] sm:$0xff]  }
  0xf9   : > { %v4189_v61 = vpop.permute.xlu1 %1022  ;;  %v4191_v62 = vpop.permute.xlu0 %1757 }
  0xfa   : > { %5716 = vst [vmem:[#allocation25_spill] sm:$0xff] %v4189_v61  ;;  %5717 = vst [vmem:[#allocation26_spill] sm:$0xff] %v4191_v62  ;;  %1062 = vperm.xlu1 %3786, %v599_v57   ;;  %1797 = vperm.xlu0 %3785, %v746_v58   ;;  %v4220_v57 = vld [vmem:[%s4211_s11 + $0x60] sm:$0xff]   ;;  %v4254_v62 = vld [vmem:[%s4211_s11 + $0xd0] sm:$0xff]  }
  0xfb   : > { %v4223_v58 = vld [vmem:[%s4211_s11] sm:$0xff]  }
  0xfc   : > { %v5747_v30 = vunpack.c.h.bf16 %v4223_v58 }
  0xfd   : > { %v4195_v9 = vpop.permute.xlu1 %1392  ;;  %v4197_v10 = vpop.permute.xlu0 %1147 }
  0xfe   : > { %5718 = vst [vmem:[#allocation27_spill] sm:$0xff] %v4195_v9  ;;  %5719 = vst [vmem:[#allocation28_spill] sm:$0xff] %v4197_v10  ;;  %1432 = vperm.xlu1 %3786, %v673_v1   ;;  %1187 = vperm.xlu0 %3785, %v624_v2   ;;  %v4226_v1 = vld [vmem:[%s4211_s11 + $0x68] sm:$0xff]   ;;  %v4270_v9 = vld [vmem:[%s4211_s11 + $0x198] sm:$0xff]   ;;  %v1986_v61 = vmul.f32 %v5747_v30, %v4059_v8 }
  0xff   : > { %v4229_v2 = vld [vmem:[%s4211_s11 + $0xc8] sm:$0xff]   ;;  %v4352_v10 = vld [vmem:[%s4211_s11 + $0xe0] sm:$0xff]  }
 0x100   : > { %5739 = vst [vmem:[#allocation48_spill] sm:$0xff] %v4352_v10  ;;  %v5751_v56 = vunpack.c.l.bf16 %v4229_v2  ;;  %v773_v8 = vld [vmem:[%s3983_s23 + $0x5e8] sm:$0xff] }
 0x101   : > { %v4202_v25 = vpop.permute.xlu1 %1882  ;;  %v4204_v26 = vpop.permute.xlu0 %1637 }
 0x102   : > { %5720 = vst [vmem:[#allocation29_spill] sm:$0xff] %v4202_v25  ;;  %5721 = vst [vmem:[#allocation30_spill] sm:$0xff] %v4204_v26  ;;  %1922 = vperm.xlu1 %3786, %v771_v17   ;;  %1677 = vperm.xlu0 %3785, %v722_v18   ;;  %v674_v26 = vld [vmem:[%s3983_s23 + $0x2d0] sm:$0xff]  ;;  %v625_v25 = vld [vmem:[%s3983_s23 + $0x148] sm:$0xff]  ;;  %v2035_v0 = vmul.f32 %v5751_v56, %v4065_v12 }
 0x105   : > { %v4213_v41 = vpop.permute.xlu1 %1517  ;;  %v4215_v42 = vpop.permute.xlu0 %1272 }
 0x106   : > { %5722 = vst [vmem:[#allocation31_spill] sm:$0xff] %v4213_v41  ;;  %5723 = vst [vmem:[#allocation32_spill] sm:$0xff] %v4215_v42  ;;  %1557 = vperm.xlu1 %3786, %v698_v33   ;;  %1312 = vperm.xlu0 %3785, %v649_v34   ;;  %v4236_v33 = vld [vmem:[%s4211_s11 + $0x8] sm:$0xff]   ;;  %v4239_v34 = vld [vmem:[%s4211_s11 + $0x130] sm:$0xff]  }
 0x107   : > { %v4242_v42 = vld [vmem:[%s4211_s11 + $0x128] sm:$0xff]   ;;  %v4245_v41 = vld [vmem:[%s4211_s11 + $0x190] sm:$0xff]  }
 0x109   : > { %v4231_v17 = vpop.permute.xlu1 %1027  ;;  %v4233_v18 = vpop.permute.xlu0 %1762 }
 0x10a   : > { %5724 = vst [vmem:[#allocation33_spill] sm:$0xff] %v4231_v17  ;;  %5725 = vst [vmem:[#allocation34_spill] sm:$0xff] %v4233_v18  ;;  %1067 = vperm.xlu1 %3786, %v600_v49   ;;  %1802 = vperm.xlu0 %3785, %v747_v50   ;;  %v4257_v49 = vld [vmem:[%s4211_s11 + $0x70] sm:$0xff]   ;;  %v4260_v50 = vld [vmem:[%s4211_s11 + $0x1f8] sm:$0xff]  }
 0x10b   : > { %v4267_v18 = vld [vmem:[%s4211_s11 + $0x1f0] sm:$0xff]   ;;  %v4297_v17 = vld [vmem:[%s4211_s11 + $0x2b8] sm:$0xff]  }
 0x10c   : > { %5729 = vst [vmem:[#allocation38_spill] sm:$0xff] %v4297_v17  ;;  %v748_v17 = vld [vmem:[%s3983_s23 + $0x520] sm:$0xff] }
 0x10d   : > { %v4275_v46 = vpop.permute.xlu1 %1397  ;;  %v4277_v45 = vpop.permute.xlu0 %1152 }
 0x10e   : > { %5726 = vst [vmem:[#allocation35_spill] sm:$0xff] %v4275_v46  ;;  %5727 = vst [vmem:[#allocation36_spill] sm:$0xff] %v4277_v45  ;;  %1437 = vperm.xlu1 %3786, %v674_v26   ;;  %1192 = vperm.xlu0 %3785, %v625_v25   ;;  %v772_v46 = vld [vmem:[%s3983_s23 + $0x5e0] sm:$0xff]  ;;  %v4306_v45 = vld [vmem:[%s4211_s11 + $0xd8] sm:$0xff]  }
 0x10f   : > { %5730 = vst [vmem:[#allocation39_spill] sm:$0xff] %v4306_v45  ;;  %v4319_v25 = vld [vmem:[%s4211_s11 + $0x200] sm:$0xff]  }
 0x110   : > { %5733 = vst [vmem:[#allocation42_spill] sm:$0xff] %v4319_v25  ;;  %v4402_v25 = vld [vmem:[%s4211_s11 + $0xe8] sm:$0xff]  }
 0x111   : > { %v4321_v26 = vpop.permute.xlu1 %1887  ;;  %v4323_v13 = vpop.permute.xlu0 %1642 }
 0x112   : > { %5734 = vst [vmem:[#allocation43_spill] sm:$0xff] %v4321_v26  ;;  %5735 = vst [vmem:[#allocation44_spill] sm:$0xff] %v4323_v13  ;;  %1927 = vperm.xlu1 %3786, %v772_v46   ;;  %1682 = vperm.xlu0 %3785, %v723_v29   ;;  %v699_v26 = vld [vmem:[%s3983_s23 + $0x398] sm:$0xff]  ;;  %v4355_v13 = vld [vmem:[%s4211_s11 + $0x268] sm:$0xff]  }
 0x113   : > { %5740 = vst [vmem:[#allocation49_spill] sm:$0xff] %v4355_v13  ;;  %v4365_v29 = vld [vmem:[%s4211_s11 + $0x208] sm:$0xff]   ;;  %v4417_v13 = vld [vmem:[%s4211_s11 + $0x270] sm:$0xff]  }
 0x115   : > { %v4367_v6 = vpop.permute.xlu1 %1522  ;;  %v4369_v46 = vpop.permute.xlu0 %1277 }
 0x116   : > { %5742 = vst [vmem:[#allocation51_spill] sm:$0xff] %v4367_v6  ;;  %5743 = vst [vmem:[#allocation52_spill] sm:$0xff] %v4369_v46  ;;  %1562 = vperm.xlu1 %3786, %v699_v26   ;;  %1317 = vperm.xlu0 %3785, %v650_v63   ;;  %v4395_v6 = vld [vmem:[%s4211_s11 + $0x2d0] sm:$0xff]   ;;  %v5746_v26 = vunpack.c.l.bf16 %v4226_v1  ;;  %v675_v46 = vld [vmem:[%s3983_s23 + $0x2d8] sm:$0xff] }
 0x118   : > { %v2011_v14 = vmul.f32 %v5746_v26, %v4057_v7  ;;  %v5749_v7 = vunpack.c.l.bf16 %v4223_v58  ;;  %v5754_v58 = vunpack.c.h.bf16 %v4226_v1  ;;  %v724_v1 = vld [vmem:[%s3983_s23 + $0x460] sm:$0xff] }
 0x119   : > { %v4404_v45 = vpop.permute.xlu1 %1032  ;;  %v4406_v63 = vpop.permute.xlu0 %1767 }
 0x11a   : > { %5744 = vst [vmem:[#allocation53_spill] sm:$0xff] %v4404_v45  ;;  %5745 = vst [vmem:[#allocation54_spill] sm:$0xff] %v4406_v63  ;;  %1072 = vperm.xlu1 %3786, %v601_v59   ;;  %1807 = vperm.xlu0 %3785, %v748_v17   ;;  %v4420_v45 = vld [vmem:[%s4211_s11 + $0x88] sm:$0xff]   ;;  %v5748_v63 = vunpack.c.h.bf16 %v4220_v57  ;;  %v1985_v26 = vmul.f32 %v5749_v7, %v4053_v4  ;;  %v5750_v59 = vunpack.c.h.bf16 %v4229_v2  ;;  %v4441_v4 = vld [vmem:[%s4211_s11 + $0x210] sm:$0xff]   ;;  %v2242_v56 = vsel %vm382_vm0, %v2011_v14, 0.0 }
 0x11b   : > { %v2012_v57 = vmul.f32 %v5754_v58, %v4069_v15  ;;  %v4469_v15 = vld [vmem:[%s4211_s11 + $0x28] sm:$0xff]  }
 0x11c   : > { %v2010_v10 = vmul.f32 %v5748_v63, %v4051_v3  ;;  %v2036_v17 = vmul.f32 %v5750_v59, %v4063_v11  ;;  %v2187_v59 = vsel %vm382_vm0, %v1986_v61, 0.0  ;;  %v5755_v63 = vunpack.c.l.bf16 %v4236_v33  ;;  %v4460_v11 = vld [vmem:[%s4211_s11 + $0x1b0] sm:$0xff]  }
 0x11d   : > { %v4445_v7 = vpop.permute.xlu1 %1402  ;;  %v4448_v2 = vpop.permute.xlu0 %1157  ;;  %v2186_v12 = vsel %vm382_vm0, %v1985_v26, 0.0 }
 0x11e   : > { %5752 = vst [vmem:[#allocation55_spill] sm:$0xff] %v4445_v7  ;;  %5753 = vst [vmem:[#allocation56_spill] sm:$0xff] %v4448_v2  ;;  %v1987_v3 = vmul.f32 %v5755_v63, %v4071_v16  ;;  %1442 = vperm.xlu1 %3786, %v675_v46   ;;  %1197 = vperm.xlu0 %3785, %v626_v5   ;;  %v2241_v30 = vsel %vm382_vm0, %v2010_v10, 0.0  ;;  %v2297_v58 = vsel %vm382_vm0, %v2036_v17, 0.0  ;;  %v2296_v16 = vsel %vm382_vm0, %v2035_v0, 0.0  ;;  %v4480_v63 = vld [vmem:[%s4211_s11 + $0x150] sm:$0xff]  }
 0x11f   : > { %v5756_v5 = vunpack.c.l.bf16 %v4239_v34  ;;  %v5757_v10 = vunpack.c.h.bf16 %v4242_v42  ;;  %v2243_v61 = vadd.f32 %v2242_v56, %v2241_v30  ;;  %v2188_v14 = vadd.f32 %v2187_v59, %v2186_v12  ;;  %v4495_v12 = vld [vmem:[%s4211_s11 + $0x2d8] sm:$0xff]   ;;  %v700_v7 = vld [vmem:[%s3983_s23 + $0x3a0] sm:$0xff] }
 0x120   : > { %v2298_v56 = vadd.f32 %v2297_v58, %v2296_v16  ;;  %v5760_v59 = vunpack.c.h.bf16 %v4236_v33  ;;  %v651_v0 = vld [vmem:[%s3983_s23 + $0x218] sm:$0xff]  ;;  %v5762_v33 = vunpack.c.h.bf16 %v4245_v41  ;;  %v652_v30 = vld [vmem:[%s3983_s23 + $0x220] sm:$0xff] }
 0x121   : > { %v2061_v46 = vmul.f32 %v5756_v5, %v4075_v19  ;;  %v2060_v26 = vmul.f32 %v5757_v10, %v4077_v20  ;;  %v4482_v2 = vpop.permute.xlu1 %1892  ;;  %v4484_v17 = vpop.permute.xlu0 %1647  ;;  %v2244_v19 = vsel %vm382_vm0, %v2012_v57, 0.0  ;;  %v2189_v5 = vsel %vm382_vm0, %v1987_v3, 0.0 }
 0x122   : > { %5758 = vst [vmem:[#allocation57_spill] sm:$0xff] %v4484_v17  ;;  %v5759_v20 = vunpack.c.l.bf16 %v4254_v62  ;;  %1932 = vperm.xlu1 %3786, %v773_v8   ;;  %1687 = vperm.xlu0 %3785, %v724_v1   ;;  %v1988_v10 = vmul.f32 %v5760_v59, %v4087_v27  ;;  %v5761_v8 = vunpack.c.l.bf16 %v4245_v41  ;;  %v2086_v27 = vmul.f32 %v5762_v33, %v4089_v28 }
 0x123   : > { %v2352_v17 = vsel %vm382_vm0, %v2061_v46, 0.0  ;;  %v2245_v58 = vadd.f32 %v2244_v19, %v2243_v61  ;;  %v2190_v16 = vadd.f32 %v2189_v5, %v2188_v14  ;;  %v5764_v28 = vunpack.c.l.bf16 %v4257_v49  ;;  %v4527_v61 = vld [vmem:[%s4211_s11 + $0xf0] sm:$0xff]   ;;  %v4530_v19 = vld [vmem:[%s4211_s11 + $0x278] sm:$0xff]  }
 0x124   : > { %v2037_v42 = vmul.f32 %v5759_v20, %v4083_v24  ;;  %v2351_v24 = vsel %vm382_vm0, %v2060_v26, 0.0  ;;  %v2085_v1 = vmul.f32 %v5761_v8, %v4081_v23  ;;  %v5763_v23 = vunpack.c.h.bf16 %v4239_v34  ;;  %5765 = vst [vmem:[#allocation58_spill] sm:$0xff] %v4527_v61  ;;  %5766 = vst [vmem:[#allocation59_spill] sm:$0xff] %v4530_v19 }
 0x125   : > { %v4512_v20 = vpop.permute.xlu1 %1527  ;;  %v4514_v59 = vpop.permute.xlu0 %1282  ;;  %v2013_v41 = vmul.f32 %v5764_v28, %v4095_v32  ;;  %v2353_v5 = vadd.f32 %v2352_v17, %v2351_v24  ;;  %v2191_v33 = vsel %vm382_vm0, %v1988_v10, 0.0  ;;  %v602_v32 = vld [vmem:[%s3983_s23 + $0x90] sm:$0xff]  ;;  %v2407_v28 = vsel %vm382_vm0, %v2086_v27, 0.0  ;;  %v5791_v10 = vld [vmem:[#allocation8_spill] sm:$0xff] }
 0x126   : > { %v2299_v3 = vsel %vm382_vm0, %v2037_v42, 0.0  ;;  %v2062_v8 = vmul.f32 %v5763_v23, %v4093_v31  ;;  %1567 = vperm.xlu1 %3786, %v700_v7   ;;  %1322 = vperm.xlu0 %3785, %v651_v0   ;;  %v5767_v42 = vunpack.c.l.bf16 %v4260_v50  ;;  %v5768_v31 = vunpack.c.h.bf16 %v4267_v18  ;;  %v749_v7 = vld [vmem:[%s3983_s23 + $0x528] sm:$0xff] }
 0x127   : > { %v2406_v0 = vsel %vm382_vm0, %v2085_v1, 0.0  ;;  %v5769_v17 = vunpack.c.l.bf16 %v4270_v9  ;;  %v2300_v14 = vadd.f32 %v2299_v3, %v2298_v56  ;;  %v2192_v27 = vadd.f32 %v2191_v33, %v2190_v16  ;;  %v676_v33 = vld [vmem:[%s3983_s23 + $0x2e0] sm:$0xff]  ;;  %v4570_v1 = vld [vmem:[%s4211_s11 + $0x218] sm:$0xff]  }
 0x128   : > { %v2111_v34 = vmul.f32 %v5767_v42, %v4099_v35  ;;  %v2110_v23 = vmul.f32 %v5768_v31, %v4101_v36  ;;  %v2354_v42 = vsel %vm382_vm0, %v2062_v8, 0.0  ;;  %v5770_v56 = vunpack.c.h.bf16 %v4254_v62  ;;  %v4560_v31 = vld [vmem:[%s4211_s11 + $0x90] sm:$0xff]   ;;  %5773 = vst [vmem:[#allocation61_spill] sm:$0xff] %v4570_v1  ;;  %v5805_v1 = vld [vmem:[#allocation12_spill] sm:$0xff] }
 0x129   : > { %v2087_v24 = vmul.f32 %v5769_v17, %v4105_v39  ;;  %v4547_v26 = vpop.permute.xlu1 %1037  ;;  %v4549_v35 = vpop.permute.xlu0 %1772  ;;  %v2246_v39 = vsel %vm382_vm0, %v2013_v41, 0.0  ;;  %5771 = vst [vmem:[#allocation60_spill] sm:$0xff] %v4560_v31  ;;  %v2408_v17 = vadd.f32 %v2407_v28, %v2406_v0  ;;  %v5772_v16 = vunpack.c.h.bf16 %v4273_v53  ;;  %v627_v41 = vld [vmem:[%s3983_s23 + $0x158] sm:$0xff]  ;;  %v5806_v31 = vld [vmem:[#allocation41_spill] sm:$0xff] }
 0x12a   : > { %v2038_v3 = vmul.f32 %v5770_v56, %v4107_v40  ;;  %1077 = vperm.xlu1 %3786, %v602_v32   ;;  %1812 = vperm.xlu0 %3785, %v749_v7   ;;  %v2462_v36 = vsel %vm382_vm0, %v2111_v34, 0.0  ;;  %v2461_v18 = vsel %vm382_vm0, %v2110_v23, 0.0  ;;  %v5774_v40 = vunpack.c.l.bf16 %v4273_v53  ;;  %v4581_v0 = vld [vmem:[%s4211_s11 + $0x1b8] sm:$0xff]  }
 0x12b   : > { %v2136_v8 = vmul.f32 %v5772_v16, %v4111_v43  ;;  %v2409_v62 = vsel %vm382_vm0, %v2087_v24, 0.0  ;;  %v5775_v7 = vunpack.c.h.bf16 %v4257_v49  ;;  %5776 = vst [vmem:[#allocation62_spill] sm:$0xff] %v4581_v0  ;;  %v2355_v43 = vadd.f32 %v2354_v42, %v2353_v5  ;;  %v5785_v53 = vld [vmem:[#allocation38_spill] sm:$0xff]  ;;  %v5822_v0 = vld [vmem:[#allocation45_spill] sm:$0xff] }
 0x12c   : > { %v2135_v32 = vmul.f32 %v5774_v40, %v4113_v44  ;;  %v2247_v28 = vadd.f32 %v2246_v39, %v2245_v58  ;;  %v5777_v56 = vunpack.c.l.bf16 %v4284_v38  ;;  %v2301_v49 = vsel %vm382_vm0, %v2038_v3, 0.0  ;;  %v774_v39 = vld [vmem:[%s3983_s23 + $0x5f0] sm:$0xff]  ;;  %v725_v40 = vld [vmem:[%s3983_s23 + $0x468] sm:$0xff] }
 0x12d   : > { %v2014_v34 = vmul.f32 %v5775_v7, %v4117_v47  ;;  %v4586_v16 = vpop.permute.xlu1 %1407  ;;  %v4588_v44 = vpop.permute.xlu0 %1162  ;;  %v2463_v47 = vadd.f32 %v2462_v36, %v2461_v18  ;;  %v2410_v42 = vadd.f32 %v2409_v62, %v2408_v17  ;;  %v4600_v36 = vld [vmem:[%s4211_s11 + $0x30] sm:$0xff]   ;;  %v5780_v17 = vunpack.c.l.bf16 %v4287_v37  ;;  %v4611_v62 = vld [vmem:[%s4211_s11 + $0x158] sm:$0xff]  }
 0x12e   : > { %v1989_v24 = vmul.f32 %v5777_v56, %v4119_v48  ;;  %1447 = vperm.xlu1 %3786, %v676_v33   ;;  %1202 = vperm.xlu0 %3785, %v627_v41   ;;  %v2517_v48 = vsel %vm382_vm0, %v2136_v8, 0.0  ;;  %5778 = vst [vmem:[#allocation63_spill] sm:$0xff] %v4600_v36  ;;  %v2516_v18 = vsel %vm382_vm0, %v2135_v32, 0.0  ;;  %v5779_v33 = vunpack.c.h.bf16 %v4260_v50  ;;  %5781 = vst [vmem:[#allocation64_spill] sm:$0xff] %v4611_v62  ;;  %v5782_v58 = vld [vmem:[#allocation37_spill] sm:$0xff]  ;;  %v5825_v62 = vld [vmem:[#allocation18_spill] sm:$0xff] }
 0x12f   : > { %v2248_v3 = vsel %vm382_vm0, %v2014_v34, 0.0  ;;  %v2063_v8 = vmul.f32 %v5780_v17, %v4125_v52  ;;  %v2302_v7 = vadd.f32 %v2301_v49, %v2300_v14  ;;  %v5783_v32 = vunpack.c.l.bf16 %v5782_v58  ;;  %v5784_v34 = vld [vmem:[#allocation6_spill] sm:$0xff]  ;;  %v4625_v52 = vld [vmem:[%s4211_s11 + $0x2e0] sm:$0xff]  }
 0x130   : > { %v2112_v41 = vmul.f32 %v5779_v33, %v4123_v51  ;;  %v2193_v56 = vsel %vm382_vm0, %v1989_v24, 0.0  ;;  %v5786_v23 = vunpack.c.h.bf16 %v5785_v53  ;;  %5788 = vst [vmem:[#allocation6_spill] sm:$0xff] %v4625_v52  ;;  %v5789_v17 = vld [vmem:[#allocation7_spill] sm:$0xff]  ;;  %v5790_v14 = vunpack.c.h.bf16 %v4270_v9 }
 0x131   : > { %v2161_v5 = vmul.f32 %v5783_v32, %v4129_v55  ;;  %v4620_v51 = vpop.permute.xlu1 %1897  ;;  %v4622_v33 = vpop.permute.xlu0 %1652  ;;  %v5792_v24 = vld [vmem:[#allocation39_spill] sm:$0xff]  ;;  %v2518_v53 = vadd.f32 %v2517_v48, %v2516_v18  ;;  %v4635_v32 = vadd.f32 %v2248_v3, %v2247_v28  ;;  %v5794_v28 = vld [vmem:[#allocation9_spill] sm:$0xff]  ;;  %v5823_v36 = vunpack.c.l.bf16 %v5822_v0 }
 0x132   : > { %v2160_v50 = vmul.f32 %v5786_v23, %v5784_v34  ;;  %5787 = vst [vmem:[#allocation37_spill] sm:$0xff] %v4622_v33  ;;  %v2088_v49 = vmul.f32 %v5790_v14, %v5789_v17  ;;  %v5793_v46 = vunpack.c.l.bf16 %v5792_v24  ;;  %1937 = vperm.xlu1 %3786, %v774_v39   ;;  %1692 = vperm.xlu0 %3785, %v725_v40   ;;  %v701_v34 = vld [vmem:[%s3983_s23 + $0x3a8] sm:$0xff]  ;;  %v2464_v14 = vsel %vm382_vm0, %v2112_v41, 0.0  ;;  %v4655_v41 = vld [vmem:[%s4211_s11 + $0xf8] sm:$0xff]   ;;  %v4666_v23 = vld [vmem:[%s4211_s11 + $0x280] sm:$0xff]  }
 0x133   : > { %v2194_v17 = vadd.f32 %v2193_v56, %v2192_v27  ;;  %v2572_v39 = vsel %vm382_vm0, %v2161_v5, 0.0  ;;  %v5795_v40 = vunpack.c.h.bf16 %v4284_v38  ;;  %5798 = vst [vmem:[#allocation8_spill] sm:$0xff] %v4655_v41  ;;  %v5802_v38 = vld [vmem:[#allocation11_spill] sm:$0xff]  ;;  %5804 = vst [vmem:[#allocation39_spill] sm:$0xff] %v4666_v23  ;;  %v2465_v55 = vadd.f32 %v2464_v14, %v2463_v47  ;;  %v5821_v47 = vld [vmem:[#allocation17_spill] sm:$0xff] }
 0x134   : > { %v2039_v57 = vmul.f32 %v5793_v46, %v5791_v10  ;;  %v2356_v46 = vsel %vm382_vm0, %v2063_v8, 0.0  ;;  %v2571_v48 = vsel %vm382_vm0, %v2160_v50, 0.0  ;;  %v2411_v8 = vsel %vm382_vm0, %v2088_v49, 0.0  ;;  %v5799_v10 = vld [vmem:[#allocation10_spill] sm:$0xff]  ;;  %v5800_v50 = vld [vmem:[#allocation40_spill] sm:$0xff]  ;;  %v4748_v52 = vld [vmem:[%s4211_s11 + $0x160] sm:$0xff]  }
 0x135   : > { %v1990_v18 = vmul.f32 %v5795_v40, %v5794_v28  ;;  %v4649_v3 = vpop.permute.xlu1 %1532  ;;  %v4651_v27 = vpop.permute.xlu0 %1287  ;;  %v5801_v9 = vunpack.c.l.bf16 %v5800_v50  ;;  %v5803_v28 = vunpack.c.h.bf16 %v4287_v37  ;;  %v2357_v56 = vadd.f32 %v2356_v46, %v2355_v43  ;;  %v604_v23 = vld [vmem:[%s3983_s23 + $0xa0] sm:$0xff] }
 0x136   : > { %5796 = vst [vmem:[#allocation38_spill] sm:$0xff] %v4649_v3  ;;  %5797 = vst [vmem:[#allocation7_spill] sm:$0xff] %v4651_v27  ;;  %v2303_v5 = vsel %vm382_vm0, %v2039_v57, 0.0  ;;  %1572 = vperm.xlu1 %3786, %v701_v34   ;;  %1327 = vperm.xlu0 %3785, %v652_v30   ;;  %v5807_v49 = vunpack.c.l.bf16 %v5806_v31  ;;  %v603_v57 = vld [vmem:[%s3983_s23 + $0x98] sm:$0xff]  ;;  %v750_v27 = vld [vmem:[%s3983_s23 + $0x530] sm:$0xff]  ;;  %v5809_v37 = vunpack.c.h.bf16 %v5782_v58  ;;  %v2412_v34 = vadd.f32 %v2411_v8, %v2410_v42 }
 0x137   : > { %v2137_v61 = vmul.f32 %v5801_v9, %v5799_v10  ;;  %v2064_v40 = vmul.f32 %v5803_v28, %v5802_v38  ;;  %v2573_v9 = vadd.f32 %v2572_v39, %v2571_v48  ;;  %v5808_v10 = vld [vmem:[#allocation13_spill] sm:$0xff]  ;;  %v2304_v43 = vadd.f32 %v2303_v5, %v2302_v7  ;;  %v4686_v58 = vld [vmem:[%s4211_s11 + $0x98] sm:$0xff]   ;;  %v4695_v5 = vld [vmem:[%s4211_s11 + $0x220] sm:$0xff]  }
 0x138   : > { %v2015_v19 = vmul.f32 %v5807_v49, %v5805_v1  ;;  %v2162_v38 = vmul.f32 %v5809_v37, %v5808_v10  ;;  %v2195_v14 = vsel %vm382_vm0, %v1990_v18, 0.0  ;;  %5812 = vst [vmem:[#allocation40_spill] sm:$0xff] %v4686_v58  ;;  %v5813_v49 = vld [vmem:[#allocation14_spill] sm:$0xff]  ;;  %5816 = vst [vmem:[#allocation11_spill] sm:$0xff] %v4695_v5  ;;  %v5817_v37 = vld [vmem:[#allocation15_spill] sm:$0xff]  ;;  %v5818_v30 = vunpack.c.l.bf16 %v4330_v22 }
 0x139   : > { %v4680_v1 = vpop.permute.xlu1 %1042  ;;  %v4682_v46 = vpop.permute.xlu0 %1777  ;;  %v2519_v48 = vsel %vm382_vm0, %v2137_v61, 0.0  ;;  %v2358_v28 = vsel %vm382_vm0, %v2064_v40, 0.0  ;;  %v5814_v42 = vld [vmem:[#allocation42_spill] sm:$0xff]  ;;  %v5819_v39 = vld [vmem:[#allocation16_spill] sm:$0xff]  ;;  %v5820_v61 = vunpack.c.h.bf16 %v5792_v24  ;;  %v2196_v18 = vadd.f32 %v2195_v14, %v2194_v17  ;;  %v5863_v58 = vld [vmem:[#allocation31_spill] sm:$0xff] }
 0x13a   : > { %5810 = vst [vmem:[#allocation9_spill] sm:$0xff] %v4680_v1  ;;  %5811 = vst [vmem:[#allocation10_spill] sm:$0xff] %v4682_v46  ;;  %v5815_v7 = vunpack.c.l.bf16 %v5814_v42  ;;  %1082 = vperm.xlu1 %3786, %v603_v57   ;;  %1817 = vperm.xlu0 %3785, %v750_v27   ;;  %v2250_v10 = vsel %vm382_vm0, %v2015_v19, 0.0  ;;  %v2089_v3 = vmul.f32 %v5818_v30, %v5817_v37  ;;  %v677_v57 = vld [vmem:[%s3983_s23 + $0x2e8] sm:$0xff]  ;;  %v628_v27 = vld [vmem:[%s3983_s23 + $0x160] sm:$0xff]  ;;  %v2574_v19 = vsel %vm382_vm0, %v2162_v38, 0.0 }
 0x13b   : > { %v2040_v40 = vmul.f32 %v5820_v61, %v5819_v39  ;;  %v5826_v46 = vunpack.c.h.bf16 %v5800_v50  ;;  %v2520_v24 = vadd.f32 %v2519_v48, %v2518_v53  ;;  %v4717_v39 = vadd.f32 %v2358_v28, %v2357_v56  ;;  %v4730_v56 = vld [vmem:[%s4211_s11 + $0x38] sm:$0xff]   ;;  %v5833_v17 = vld [vmem:[#allocation20_spill] sm:$0xff]  ;;  %5838 = vst [vmem:[#allocation42_spill] sm:$0xff] %v4748_v52 }
 0x13c   : > { %v2113_v8 = vmul.f32 %v5815_v7, %v5813_v49  ;;  %v1991_v49 = vmul.f32 %v5823_v36, %v5821_v47  ;;  %v4710_v7 = vld [vmem:[%s4211_s11 + $0x1c0] sm:$0xff]   ;;  %v2251_v38 = vadd.f32 %v2250_v10, %v4635_v32  ;;  %5829 = vst [vmem:[#allocation14_spill] sm:$0xff] %v4730_v56  ;;  %v2575_v14 = vadd.f32 %v2574_v19, %v2573_v9  ;;  %v775_v32 = vld [vmem:[%s3983_s23 + $0x5f8] sm:$0xff]  ;;  %v726_v10 = vld [vmem:[%s3983_s23 + $0x470] sm:$0xff] }
 0x13d   : > { %5824 = vst [vmem:[#allocation12_spill] sm:$0xff] %v4710_v7  ;;  %v2138_v30 = vmul.f32 %v5826_v46, %v5825_v62  ;;  %v4719_v61 = vpop.permute.xlu1 %1412  ;;  %v4721_v36 = vpop.permute.xlu0 %1167  ;;  %v2413_v46 = vsel %vm382_vm0, %v2089_v3, 0.0  ;;  %v2305_v48 = vsel %vm382_vm0, %v2040_v40, 0.0  ;;  %v5834_v53 = vunpack.c.h.bf16 %v5806_v31  ;;  %v5835_v9 = vld [vmem:[#allocation21_spill] sm:$0xff]  ;;  %v5836_v19 = vld [vmem:[#allocation47_spill] sm:$0xff]  ;;  %v5877_v7 = vld [vmem:[#allocation44_spill] sm:$0xff] }
 0x13e   : > { %5827 = vst [vmem:[#allocation41_spill] sm:$0xff] %v4719_v61  ;;  %5828 = vst [vmem:[#allocation13_spill] sm:$0xff] %v4721_v36  ;;  %v2466_v50 = vsel %vm382_vm0, %v2113_v8, 0.0  ;;  %1452 = vperm.xlu1 %3786, %v677_v57   ;;  %1207 = vperm.xlu0 %3785, %v628_v27   ;;  %v2197_v28 = vsel %vm382_vm0, %v1991_v49, 0.0  ;;  %v5830_v57 = vld [vmem:[#allocation19_spill] sm:$0xff]  ;;  %v5831_v27 = vld [vmem:[#allocation46_spill] sm:$0xff]  ;;  %v5837_v3 = vunpack.c.l.bf16 %v5836_v19  ;;  %v5840_v36 = vunpack.c.h.bf16 %v5814_v42 }
 0x13f   : > { %v2521_v8 = vsel %vm382_vm0, %v2138_v30, 0.0  ;;  %v5832_v47 = vunpack.c.l.bf16 %v5831_v27  ;;  %v2016_v37 = vmul.f32 %v5834_v53, %v5833_v17  ;;  %v2467_v40 = vadd.f32 %v2466_v50, %v2465_v55  ;;  %v5839_v49 = vld [vmem:[#allocation22_spill] sm:$0xff]  ;;  %v5841_v61 = vld [vmem:[#allocation23_spill] sm:$0xff]  ;;  %v4762_v53 = vld [vmem:[%s4211_s11 + $0x2e8] sm:$0xff]  }
 0x140   : > { %v2163_v41 = vmul.f32 %v5837_v3, %v5835_v9  ;;  %v2114_v30 = vmul.f32 %v5840_v36, %v5839_v49  ;;  %5844 = vst [vmem:[#allocation16_spill] sm:$0xff] %v4762_v53  ;;  %v2414_v9 = vadd.f32 %v2413_v46, %v2412_v34  ;;  %v2306_v3 = vadd.f32 %v2305_v48, %v2304_v43  ;;  %v5845_v55 = vld [vmem:[#allocation24_spill] sm:$0xff]  ;;  %v702_v49 = vld [vmem:[%s3983_s23 + $0x3b0] sm:$0xff] }
 0x141   : > { %v2065_v62 = vmul.f32 %v5832_v47, %v5830_v57  ;;  %v5842_v47 = vunpack.c.h.bf16 %v4330_v22  ;;  %v4756_v1 = vpop.permute.xlu1 %1902  ;;  %v4758_v31 = vpop.permute.xlu0 %1657  ;;  %v5846_v50 = vld [vmem:[#allocation48_spill] sm:$0xff]  ;;  %v2198_v22 = vadd.f32 %v2197_v28, %v2196_v18  ;;  %v2252_v34 = vsel %vm382_vm0, %v2016_v37, 0.0 }
 0x142   : > { %5843 = vst [vmem:[#allocation15_spill] sm:$0xff] %v4758_v31  ;;  %v5847_v33 = vunpack.c.l.bf16 %v5846_v50  ;;  %1942 = vperm.xlu1 %3786, %v775_v32   ;;  %1697 = vperm.xlu0 %3785, %v726_v10   ;;  %v2576_v43 = vsel %vm382_vm0, %v2163_v41, 0.0  ;;  %v2468_v46 = vsel %vm382_vm0, %v2114_v30, 0.0  ;;  %v5849_v48 = vunpack.c.h.bf16 %v5822_v0  ;;  %v5850_v32 = vld [vmem:[#allocation26_spill] sm:$0xff]  ;;  %v5851_v10 = vld [vmem:[#allocation49_spill] sm:$0xff]  ;;  %v5856_v31 = vld [vmem:[#allocation28_spill] sm:$0xff] }
 0x143   : > { %v2090_v57 = vmul.f32 %v5842_v47, %v5841_v61  ;;  %v2522_v61 = vadd.f32 %v2521_v8, %v2520_v24  ;;  %v653_v47 = vld [vmem:[%s3983_s23 + $0x228] sm:$0xff]  ;;  %v2360_v56 = vsel %vm382_vm0, %v2065_v62, 0.0  ;;  %v5848_v24 = vld [vmem:[#allocation25_spill] sm:$0xff]  ;;  %v5852_v8 = vunpack.c.l.bf16 %v5851_v10 }
 0x144   : > { %v2041_v42 = vmul.f32 %v5847_v33, %v5845_v55  ;;  %v1992_v28 = vmul.f32 %v5849_v48, %v5848_v24  ;;  %v5854_v33 = vld [vmem:[#allocation27_spill] sm:$0xff]  ;;  %v5855_v30 = vunpack.c.h.bf16 %v5831_v27  ;;  %v5859_v0 = vld [vmem:[#allocation29_spill] sm:$0xff]  ;;  %v5860_v24 = vunpack.c.h.bf16 %v5836_v19  ;;  %v5865_v27 = vld [vmem:[#allocation32_spill] sm:$0xff] }
 0x145   : > { %v2415_v18 = vsel %vm382_vm0, %v2090_v57, 0.0  ;;  %v2139_v62 = vmul.f32 %v5852_v8, %v5850_v32  ;;  %v4784_v55 = vpop.permute.xlu1 %1537  ;;  %v4786_v37 = vpop.permute.xlu0 %1292  ;;  %v5857_v57 = vld [vmem:[#allocation50_spill] sm:$0xff]  ;;  %v5862_v8 = vunpack.c.l.bf16 %v4365_v29  ;;  %v2361_v19 = vadd.f32 %v2360_v56, %v4717_v39 }
 0x146   : > { %5853 = vst [vmem:[#allocation17_spill] sm:$0xff] %v4786_v37  ;;  %v2307_v41 = vsel %vm382_vm0, %v2041_v42, 0.0  ;;  %v2066_v17 = vmul.f32 %v5855_v30, %v5854_v33  ;;  %v5858_v36 = vunpack.c.l.bf16 %v5857_v57  ;;  %v2164_v48 = vmul.f32 %v5860_v24, %v5859_v0  ;;  %1577 = vperm.xlu1 %3786, %v702_v49   ;;  %1332 = vperm.xlu0 %3785, %v653_v47   ;;  %v5861_v32 = vld [vmem:[#allocation30_spill] sm:$0xff] }
 0x147   : > { %v2115_v52 = vmul.f32 %v5862_v8, %v5861_v32  ;;  %v5864_v42 = vunpack.c.l.bf16 %v4376_v60  ;;  %v5866_v33 = vunpack.c.h.bf16 %v5846_v50  ;;  %v2253_v49 = vadd.f32 %v2252_v34, %v2251_v38 }
 0x148   : > { %v2017_v53 = vmul.f32 %v5858_v36, %v5856_v31  ;;  %v751_v31 = vld [vmem:[%s3983_s23 + $0x538] sm:$0xff]  ;;  %v2577_v47 = vadd.f32 %v2576_v43, %v2575_v14  ;;  %v2469_v24 = vadd.f32 %v2468_v46, %v2467_v40  ;;  %v2416_v32 = vadd.f32 %v2415_v18, %v2414_v9  ;;  %v678_v46 = vld [vmem:[%s3983_s23 + $0x2f0] sm:$0xff]  ;;  %v629_v18 = vld [vmem:[%s3983_s23 + $0x168] sm:$0xff] }
 0x149   : > { %v2091_v37 = vmul.f32 %v5864_v42, %v5863_v58  ;;  %v2042_v30 = vmul.f32 %v5866_v33, %v5865_v27  ;;  %v2308_v8 = vadd.f32 %v2307_v41, %v2306_v3  ;;  %v2199_v58 = vsel %vm382_vm0, %v1992_v28, 0.0  ;;  %v4813_v50 = vpop.permute.xlu1 %1047  ;;  %v4815_v42 = vpop.permute.xlu0 %1782  ;;  %v5867_v3 = vld [vmem:[#allocation33_spill] sm:$0xff]  ;;  %v4830_v28 = vld [vmem:[%s4211_s11 + $0x100] sm:$0xff]  }
 0x14a   : > { %v2523_v27 = vsel %vm382_vm0, %v2139_v62, 0.0  ;;  %v2362_v39 = vsel %vm382_vm0, %v2066_v17, 0.0  ;;  %v2254_v38 = vsel %vm382_vm0, %v2017_v53, 0.0  ;;  %v2578_v56 = vsel %vm382_vm0, %v2164_v48, 0.0  ;;  %1087 = vperm.xlu1 %3786, %v604_v23   ;;  %1822 = vperm.xlu0 %3785, %v751_v31   ;;  %v5869_v17 = vld [vmem:[#allocation34_spill] sm:$0xff]  ;;  %v5871_v23 = vld [vmem:[#allocation35_spill] sm:$0xff] }
 0x14b   : > { %v2470_v14 = vsel %vm382_vm0, %v2115_v52, 0.0  ;;  %v2417_v40 = vsel %vm382_vm0, %v2091_v37, 0.0  ;;  %v2309_v9 = vsel %vm382_vm0, %v2042_v30, 0.0  ;;  %v5868_v34 = vunpack.c.l.bf16 %v4379_v54  ;;  %v5873_v48 = vld [vmem:[#allocation36_spill] sm:$0xff]  ;;  %v5875_v30 = vld [vmem:[#allocation43_spill] sm:$0xff] }
 0x14c   : > { %v5870_v53 = vunpack.c.h.bf16 %v5851_v10  ;;  %v5872_v41 = vunpack.c.l.bf16 %v4386_v21  ;;  %v5874_v37 = vunpack.c.h.bf16 %v5857_v57  ;;  %v5876_v31 = vunpack.c.l.bf16 %v4395_v6 }
 0x14d   : > { %v1993_v43 = vmul.f32 %v5868_v34, %v5867_v3  ;;  %v2200_v34 = vadd.f32 %v2199_v58, %v2198_v22  ;;  %v2524_v0 = vadd.f32 %v2523_v27, %v2522_v61  ;;  %v2363_v36 = vadd.f32 %v2362_v39, %v2361_v19  ;;  %v727_v27 = vld [vmem:[%s3983_s23 + $0x478] sm:$0xff] }
 0x14e   : > { %v2140_v62 = vmul.f32 %v5870_v53, %v5869_v17  ;;  %v2067_v52 = vmul.f32 %v5872_v41, %v5871_v23  ;;  %v2018_v33 = vmul.f32 %v5874_v37, %v5873_v48  ;;  %v2165_v3 = vmul.f32 %v5876_v31, %v5875_v30  ;;  %v4847_v53 = vpop.permute.xlu1 %1417  ;;  %v4849_v23 = vpop.permute.xlu0 %1172  ;;  %v5879_v48 = vld [vmem:[#allocation51_spill] sm:$0xff]  ;;  %1457 = vperm.xlu1 %3786, %v678_v46  }
 0x14f   : > { %v5878_v10 = vunpack.c.h.bf16 %v4365_v29  ;;  %v2255_v41 = vadd.f32 %v2254_v38, %v2253_v49  ;;  %v2579_v57 = vadd.f32 %v2578_v56, %v2577_v47  ;;  %v5880_v37 = vunpack.c.h.bf16 %v4376_v60  ;;  %1212 = vperm.xlu0 %3785, %v629_v18   ;;  %v5881_v56 = vld [vmem:[#allocation52_spill] sm:$0xff] }
 0x150   : > { %v3181_v22 = vunpack.c.l.bf16 %v4830_v28  ;;  %v2471_v61 = vadd.f32 %v2470_v14, %v2469_v24  ;;  %v2418_v19 = vadd.f32 %v2417_v40, %v2416_v32  ;;  %v2310_v58 = vadd.f32 %v2309_v9, %v2308_v8  ;;  %v5883_v32 = vld [vmem:[#allocation53_spill] sm:$0xff]  ;;  %v5885_v40 = vld [vmem:[#allocation54_spill] sm:$0xff] }
 0x151   : > { %v2116_v17 = vmul.f32 %v5878_v10, %v5877_v7  ;;  %v2092_v5 = vmul.f32 %v5880_v37, %v5879_v48  ;;  %v2201_v29 = vsel %vm382_vm0, %v1993_v43, 0.0  ;;  %v776_v7 = vld [vmem:[%s3983_s23 + $0x600] sm:$0xff]  ;;  %v2525_v39 = vsel %vm382_vm0, %v2140_v62, 0.0 }
 0x152   : > { %v2364_v49 = vsel %vm382_vm0, %v2067_v52, 0.0  ;;  %v2256_v47 = vsel %vm382_vm0, %v2018_v33, 0.0  ;;  %v2580_v60 = vsel %vm382_vm0, %v2165_v3, 0.0  ;;  %v5882_v46 = vunpack.c.l.bf16 %v4402_v25  ;;  %v4872_v18 = vpop.permute.xlu1 %1907  ;;  %v4874_v62 = vpop.permute.xlu0 %1662  ;;  %v5887_v33 = vld [vmem:[#allocation55_spill] sm:$0xff]  ;;  %v5889_v3 = vld [vmem:[#allocation56_spill] sm:$0xff]  ;;  %1947 = vperm.xlu1 %3786, %v776_v7  }
 0x153   : > { %v2472_v38 = vsel %vm382_vm0, %v2116_v17, 0.0  ;;  %v5884_v8 = vunpack.c.h.bf16 %v4379_v54  ;;  %v5886_v9 = vunpack.c.l.bf16 %v4417_v13  ;;  %v2419_v52 = vsel %vm382_vm0, %v2092_v5, 0.0  ;;  %1702 = vperm.xlu0 %3785, %v727_v27  }
 0x154   : > { %v2043_v24 = vmul.f32 %v5882_v46, %v5881_v56  ;;  %v5888_v30 = vunpack.c.h.bf16 %v4386_v21  ;;  %v5890_v10 = vunpack.c.l.bf16 %v4420_v45  ;;  %v5891_v17 = vunpack.c.h.bf16 %v4395_v6  ;;  %v654_v21 = vld [vmem:[%s3983_s23 + $0x230] sm:$0xff] }
 0x155   : > { %v1994_v14 = vmul.f32 %v5884_v8, %v5883_v32  ;;  %v2141_v43 = vmul.f32 %v5886_v9, %v5885_v40  ;;  %v2202_v37 = vadd.f32 %v2201_v29, %v2200_v34  ;;  %v2526_v56 = vadd.f32 %v2525_v39, %v2524_v0  ;;  %v5892_v32 = vld [vmem:[#allocation57_spill] sm:$0xff]  ;;  %v703_v40 = vld [vmem:[%s3983_s23 + $0x3b8] sm:$0xff] }
 0x156   : > { %v2068_v31 = vmul.f32 %v5888_v30, %v5887_v33  ;;  %v2019_v54 = vmul.f32 %v5890_v10, %v5889_v3  ;;  %v2166_v48 = vmul.f32 %v5891_v17, %v4482_v2  ;;  %v2365_v46 = vadd.f32 %v2364_v49, %v2363_v36  ;;  %v4897_v34 = vpop.permute.xlu1 %1542  ;;  %v4899_v29 = vpop.permute.xlu0 %1297  ;;  %1582 = vperm.xlu1 %3786, %v703_v40  }
 0x157   : > { %v5893_v5 = vunpack.c.l.bf16 %v4441_v4  ;;  %v2257_v9 = vadd.f32 %v2256_v47, %v2255_v41  ;;  %v2581_v33 = vadd.f32 %v2580_v60, %v2579_v57  ;;  %v2473_v30 = vadd.f32 %v2472_v38, %v2471_v61  ;;  %1337 = vperm.xlu0 %3785, %v654_v21   ;;  %v630_v21 = vld [vmem:[%s3983_s23 + $0x170] sm:$0xff] }
 0x158   : > { %v5894_v3 = vunpack.c.l.bf16 %v4460_v11  ;;  %v2420_v6 = vadd.f32 %v2419_v52, %v2418_v19  ;;  %v2311_v2 = vsel %vm382_vm0, %v2043_v24, 0.0  ;;  %v2203_v36 = vsel %vm382_vm0, %v1994_v14, 0.0  ;;  %v605_v24 = vld [vmem:[%s3983_s23 + $0xa8] sm:$0xff]  ;;  %v752_v14 = vld [vmem:[%s3983_s23 + $0x540] sm:$0xff] }
 0x159   : > { %v2117_v8 = vmul.f32 %v5893_v5, %v5892_v32  ;;  %v2527_v0 = vsel %vm382_vm0, %v2141_v43, 0.0  ;;  %v2366_v41 = vsel %vm382_vm0, %v2068_v31, 0.0  ;;  %v2258_v57 = vsel %vm382_vm0, %v2019_v54, 0.0 }
 0x15a   : > { %v2093_v10 = vmul.f32 %v5894_v3, %v4512_v20  ;;  %v2582_v61 = vsel %vm382_vm0, %v2166_v48, 0.0  ;;  %v5895_v20 = vunpack.c.h.bf16 %v4402_v25  ;;  %v5896_v27 = vunpack.c.l.bf16 %v4469_v15  ;;  %v1788_v48 = vpop.permute.xlu0 %1787  ;;  %1092 = vperm.xlu1 %3786, %v605_v24  }
 0x15b   : > { %v2474_v7 = vsel %vm382_vm0, %v2117_v8, 0.0  ;;  %v5897_v49 = vunpack.c.h.bf16 %v4417_v13  ;;  %v5898_v60 = vunpack.c.l.bf16 %v4480_v63  ;;  %v2312_v25 = vadd.f32 %v2311_v2, %v2310_v58  ;;  %v5901_v8 = vld [vmem:[#allocation37_spill] sm:$0xff]  ;;  %1827 = vperm.xlu0 %3785, %v752_v14   ;;  %v5906_v2 = vld [vmem:[#allocation58_spill] sm:$0xff] }
 0x15c   : > { %v2044_v19 = vmul.f32 %v5895_v20, %v4514_v59  ;;  %v1995_v39 = vmul.f32 %v5896_v27, %v4547_v26  ;;  %v2421_v59 = vsel %vm382_vm0, %v2093_v10, 0.0  ;;  %v5899_v43 = vunpack.c.h.bf16 %v4420_v45  ;;  %v5905_v10 = vld [vmem:[#allocation7_spill] sm:$0xff]  ;;  %v5910_v20 = vld [vmem:[#allocation10_spill] sm:$0xff] }
 0x15d   : > { %v2142_v47 = vmul.f32 %v5897_v49, %v4549_v35  ;;  %v2069_v38 = vmul.f32 %v5898_v60, %v4586_v16  ;;  %v5900_v26 = vunpack.c.l.bf16 %v4495_v12  ;;  %v2204_v54 = vadd.f32 %v2203_v36, %v2202_v37  ;;  %v1053_v16 = vpop.permute.xlu1 %1052 }
 0x15e   : > { %v2020_v52 = vmul.f32 %v5899_v43, %v4588_v44  ;;  %v2528_v13 = vadd.f32 %v2527_v0, %v2526_v56  ;;  %v2367_v35 = vadd.f32 %v2366_v41, %v2365_v46  ;;  %v2259_v17 = vadd.f32 %v2258_v57, %v2257_v9  ;;  %v679_v46 = vld [vmem:[%s3983_s23 + $0x2f8] sm:$0xff]  ;;  %v5908_v41 = vld [vmem:[#allocation9_spill] sm:$0xff]  ;;  %v1178_v60 = vpop.permute.xlu0 %1177 }
 0x15f   : > { %v2167_v31 = vmul.f32 %v5900_v26, %v4620_v51  ;;  %v2583_v32 = vadd.f32 %v2582_v61, %v2581_v33  ;;  %v2475_v58 = vadd.f32 %v2474_v7, %v2473_v30  ;;  %v2313_v5 = vsel %vm382_vm0, %v2044_v19, 0.0  ;;  %v5903_v30 = vld [vmem:[#allocation38_spill] sm:$0xff]  ;;  %v5911_v19 = vld [vmem:[#allocation59_spill] sm:$0xff]  ;;  %1462 = vperm.xlu1 %3786, %v679_v46   ;;  %1217 = vperm.xlu0 %3785, %v630_v21  }
 0x160   : > { %v5902_v45 = vunpack.c.h.bf16 %v4441_v4  ;;  %v2422_v40 = vadd.f32 %v2421_v59, %v2420_v6  ;;  %v2205_v51 = vsel %vm382_vm0, %v1995_v39, 0.0  ;;  %v2529_v37 = vsel %vm382_vm0, %v2142_v47, 0.0  ;;  %v5913_v39 = vld [vmem:[#allocation41_spill] sm:$0xff]  ;;  %v5916_v59 = vld [vmem:[#allocation60_spill] sm:$0xff]  ;;  %v5922_v46 = vld [vmem:[#allocation63_spill] sm:$0xff] }
 0x161   : > { %v2368_v56 = vsel %vm382_vm0, %v2069_v38, 0.0  ;;  %v2260_v9 = vsel %vm382_vm0, %v2020_v52, 0.0  ;;  %v2584_v33 = vsel %vm382_vm0, %v2167_v31, 0.0  ;;  %v5904_v3 = vunpack.c.h.bf16 %v4460_v11  ;;  %v1423_v47 = vpop.permute.xlu1 %1422 }
 0x162   : > { %v2118_v44 = vmul.f32 %v5902_v45, %v5901_v8  ;;  %v5907_v36 = vunpack.c.l.bf16 %v5906_v2  ;;  %v2314_v0 = vadd.f32 %v2313_v5, %v2312_v25  ;;  %v5909_v57 = vunpack.c.h.bf16 %v4469_v15  ;;  %v5915_v25 = vld [vmem:[#allocation13_spill] sm:$0xff]  ;;  %v777_v8 = vld [vmem:[%s3983_s23 + $0x608] sm:$0xff]  ;;  %v728_v45 = vld [vmem:[%s3983_s23 + $0x480] sm:$0xff] }
 0x163   : > { %v2094_v4 = vmul.f32 %v5904_v3, %v5903_v30  ;;  %v5912_v7 = vunpack.c.l.bf16 %v5911_v19  ;;  %v5914_v49 = vunpack.c.h.bf16 %v4480_v63  ;;  %v2206_v38 = vadd.f32 %v2205_v51, %v2204_v54  ;;  %v5920_v51 = vld [vmem:[#allocation61_spill] sm:$0xff]  ;;  %1952 = vperm.xlu1 %3786, %v777_v8   ;;  %1707 = vperm.xlu0 %3785, %v728_v45  }
 0x164   : > { %v2045_v6 = vmul.f32 %v5907_v36, %v5905_v10  ;;  %v1996_v61 = vmul.f32 %v5909_v57, %v5908_v41  ;;  %v2530_v24 = vadd.f32 %v2529_v37, %v2528_v13  ;;  %v2476_v14 = vsel %vm382_vm0, %v2118_v44, 0.0  ;;  %v5919_v44 = vld [vmem:[#allocation15_spill] sm:$0xff]  ;;  %v5925_v10 = vld [vmem:[#allocation64_spill] sm:$0xff] }
 0x165   : > { %v2143_v27 = vmul.f32 %v5912_v7, %v5910_v20  ;;  %v2070_v11 = vmul.f32 %v5914_v49, %v5913_v39  ;;  %v5917_v15 = vunpack.c.l.bf16 %v5916_v59  ;;  %v2369_v52 = vadd.f32 %v2368_v56, %v2367_v35  ;;  %v1913_v56 = vpop.permute.xlu1 %1912  ;;  %v5928_v20 = vld [vmem:[#allocation62_spill] sm:$0xff]  ;;  %v704_v7 = vld [vmem:[%s3983_s23 + $0x3c0] sm:$0xff] }
 0x166   : > { %v2261_v26 = vadd.f32 %v2260_v9, %v2259_v17  ;;  %v2585_v31 = vadd.f32 %v2584_v33, %v2583_v32  ;;  %v5918_v5 = vunpack.c.h.bf16 %v4495_v12  ;;  %v2423_v54 = vsel %vm382_vm0, %v2094_v4, 0.0  ;;  %v1668_v9 = vpop.permute.xlu0 %1667 }
 0x167   : > { %v2021_v43 = vmul.f32 %v5917_v15, %v5915_v25  ;;  %v2315_v13 = vsel %vm382_vm0, %v2045_v6, 0.0  ;;  %v5921_v37 = vunpack.c.l.bf16 %v5920_v51  ;;  %v5923_v21 = vunpack.c.l.bf16 %v5922_v46  ;;  %1587 = vperm.xlu1 %3786, %v704_v7  }
 0x168   : > { %v2168_v63 = vmul.f32 %v5918_v5, %v4756_v1  ;;  %v2477_v17 = vadd.f32 %v2476_v14, %v2475_v58  ;;  %v2207_v32 = vsel %vm382_vm0, %v1996_v61, 0.0  ;;  %v2531_v12 = vsel %vm382_vm0, %v2143_v27, 0.0  ;;  %v655_v27 = vld [vmem:[%s3983_s23 + $0x238] sm:$0xff]  ;;  %v5933_v5 = vld [vmem:[#allocation17_spill] sm:$0xff] }
 0x169   : > { %v2119_v30 = vmul.f32 %v5921_v37, %v5919_v44  ;;  %v1997_v35 = vmul.f32 %v5923_v21, %v4813_v50  ;;  %v2370_v1 = vsel %vm382_vm0, %v2070_v11, 0.0  ;;  %v2262_v33 = vsel %vm382_vm0, %v2021_v43, 0.0  ;;  %v5931_v11 = vld [vmem:[#allocation39_spill] sm:$0xff]  ;;  %v1548_v43 = vpop.permute.xlu1 %1547  ;;  %1342 = vperm.xlu0 %3785, %v655_v27  }
 0x16a   : > { %v5924_v3 = vunpack.c.h.bf16 %v5911_v19  ;;  %v5926_v50 = vunpack.c.l.bf16 %v5925_v10  ;;  %v5927_v36 = vunpack.c.h.bf16 %v5916_v59  ;;  %v4982_v41 = vadd.f32 %v2423_v54, %v2422_v40  ;;  %v5945_v27 = vld [vmem:[#allocation11_spill] sm:$0xff] }
 0x16b   : > { %v4984_v57 = vadd.f32 %v2315_v13, %v2314_v0  ;;  %v2586_v61 = vsel %vm382_vm0, %v2168_v63, 0.0  ;;  %v5929_v19 = vunpack.c.l.bf16 %v5928_v20  ;;  %v2209_v39 = vsel %vm382_vm0, %v1997_v35, 0.0  ;;  %v753_v13 = vld [vmem:[%s3983_s23 + $0x548] sm:$0xff] }
 0x16c   : > { %v2144_v4 = vmul.f32 %v5924_v3, %v4815_v42  ;;  %v2071_v58 = vmul.f32 %v5926_v50, %v4847_v53  ;;  %v2022_v6 = vmul.f32 %v5927_v36, %v4849_v23  ;;  %v2478_v53 = vsel %vm382_vm0, %v2119_v30, 0.0 }
 0x16d   : > { %v2095_v42 = vmul.f32 %v5929_v19, %v4784_v55  ;;  %v5930_v23 = vunpack.c.h.bf16 %v5922_v46  ;;  %v5932_v40 = vunpack.c.l.bf16 %v5931_v11  ;;  %v2208_v0 = vadd.f32 %v2207_v32, %v2206_v38  ;;  %v1303_v55 = vpop.permute.xlu0 %1302  ;;  %v5936_v46 = vld [vmem:[#allocation40_spill] sm:$0xff]  ;;  %v1058_v3 = vpop.permute.xlu1 %1057  ;;  %1832 = vperm.xlu0 %3785, %v753_v13  }
 0x16e   : > { %v2532_v25 = vadd.f32 %v2531_v12, %v2530_v24  ;;  %v2371_v59 = vadd.f32 %v2370_v1, %v2369_v52  ;;  %v2263_v15 = vadd.f32 %v2262_v33, %v2261_v26  ;;  %v5934_v63 = vunpack.c.h.bf16 %v5906_v2  ;;  %v606_v26 = vld [vmem:[%s3983_s23 + $0xb0] sm:$0xff]  ;;  %v5938_v12 = vld [vmem:[#allocation6_spill] sm:$0xff] }
 0x16f   : > { %v1998_v49 = vmul.f32 %v5930_v23, %v1053_v16  ;;  %v2145_v14 = vmul.f32 %v5932_v40, %v1788_v48  ;;  %v2533_v45 = vsel %vm382_vm0, %v2144_v4, 0.0  ;;  %v2372_v54 = vsel %vm382_vm0, %v2071_v58, 0.0  ;;  %v5941_v58 = vld [vmem:[#allocation14_spill] sm:$0xff]  ;;  %1097 = vperm.xlu1 %3786, %v606_v26   ;;  %v680_v23 = vld [vmem:[%s3983_s23 + $0x300] sm:$0xff] }
 0x170   : > { %v2046_v8 = vmul.f32 %v5934_v63, %v5933_v5  ;;  %v2264_v16 = vsel %vm382_vm0, %v2022_v6, 0.0  ;;  %v2587_v48 = vadd.f32 %v2586_v61, %v2585_v31  ;;  %v2479_v38 = vadd.f32 %v2478_v53, %v2477_v17  ;;  %v5948_v63 = vld [vmem:[#allocation8_spill] sm:$0xff] }
 0x171   : > { %v5005_v24 = vsel %vm382_vm0, %v2095_v42, 0.0  ;;  %v2210_v52 = vadd.f32 %v2209_v39, %v2208_v0  ;;  %v2211_v44 = vsel %vm382_vm0, %v1998_v49, 0.0  ;;  %v2535_v2 = vsel %vm382_vm0, %v2145_v14, 0.0  ;;  %v1793_v4 = vpop.permute.xlu0 %1792  ;;  %v631_v49 = vld [vmem:[%s3983_s23 + $0x178] sm:$0xff] }
 0x172   : > { %v5935_v37 = vunpack.c.h.bf16 %v5925_v10  ;;  %v5937_v21 = vunpack.c.l.bf16 %v5936_v46  ;;  %v2534_v32 = vadd.f32 %v2533_v45, %v2532_v25  ;;  %v2373_v31 = vadd.f32 %v2372_v54, %v2371_v59  ;;  %v1428_v59 = vpop.permute.xlu1 %1427  ;;  %v5950_v54 = vld [vmem:[#allocation42_spill] sm:$0xff]  ;;  %1222 = vperm.xlu0 %3785, %v631_v49  }
 0x173   : > { %v2265_v17 = vadd.f32 %v2264_v16, %v2263_v15  ;;  %v5939_v1 = vunpack.c.l.bf16 %v5938_v12  ;;  %v2317_v50 = vsel %vm382_vm0, %v2046_v8, 0.0  ;;  %v5940_v10 = vunpack.c.h.bf16 %v5920_v51  ;;  %1467 = vperm.xlu1 %3786, %v680_v23  }
 0x174   : > { %v2072_v30 = vmul.f32 %v5935_v37, %v1423_v47  ;;  %v2023_v35 = vmul.f32 %v5937_v21, %v1178_v60  ;;  %v5942_v36 = vunpack.c.l.bf16 %v5941_v58  ;;  %v5943_v6 = vunpack.c.h.bf16 %v5931_v11  ;;  %v778_v37 = vld [vmem:[%s3983_s23 + $0x610] sm:$0xff]  ;;  %v5953_v21 = vld [vmem:[#allocation12_spill] sm:$0xff] }
 0x175   : > { %v2169_v33 = vmul.f32 %v5939_v1, %v4872_v18  ;;  %v2120_v47 = vmul.f32 %v5940_v10, %v4874_v62  ;;  %v2212_v19 = vadd.f32 %v2211_v44, %v2210_v52  ;;  %v2536_v42 = vadd.f32 %v2535_v2, %v2534_v32  ;;  %v1183_v15 = vpop.permute.xlu0 %1182 }
 0x176   : > { %v1999_v60 = vmul.f32 %v5942_v36, %v1058_v3  ;;  %v2146_v61 = vmul.f32 %v5943_v6, %v1793_v4  ;;  %v5944_v18 = vunpack.c.h.bf16 %v5938_v12  ;;  %v5946_v53 = vunpack.c.l.bf16 %v5945_v27  ;;  %v1918_v4 = vpop.permute.xlu1 %1917 }
 0x177   : > { %v2374_v62 = vsel %vm382_vm0, %v2072_v30, 0.0  ;;  %v2266_v51 = vsel %vm382_vm0, %v2023_v35, 0.0  ;;  %v2588_v14 = vsel %vm382_vm0, %v2169_v33, 0.0  ;;  %v5947_v0 = vunpack.c.h.bf16 %v5928_v20  ;;  %v729_v30 = vld [vmem:[%s3983_s23 + $0x488] sm:$0xff]  ;;  %1957 = vperm.xlu1 %3786, %v778_v37   ;;  %v632_v37 = vld [vmem:[%s3983_s23 + $0x180] sm:$0xff] }
 0x178   : > { %v2170_v7 = vmul.f32 %v5944_v18, %v1913_v56  ;;  %v2121_v39 = vmul.f32 %v5946_v53, %v1668_v9  ;;  %v2213_v40 = vsel %vm382_vm0, %v1999_v60, 0.0  ;;  %v2537_v11 = vsel %vm382_vm0, %v2146_v61, 0.0  ;;  %1712 = vperm.xlu0 %3785, %v729_v30   ;;  %v705_v18 = vld [vmem:[%s3983_s23 + $0x3c8] sm:$0xff] }
 0x179   : > { %v2096_v56 = vmul.f32 %v5947_v0, %v4897_v34  ;;  %v5040_v25 = vadd.f32 %v2213_v40, %v2212_v19  ;;  %v5042_v9 = vadd.f32 %v2537_v11, %v2536_v42  ;;  %v2480_v5 = vsel %vm382_vm0, %v2120_v47, 0.0  ;;  %v1673_v10 = vpop.permute.xlu0 %1672  ;;  %v5078_v53 = vld [vmem:[%s4211_s11 + $0x288] sm:$0xff]  }
 0x17a   : > { %v5949_v8 = vunpack.c.l.bf16 %v5948_v63  ;;  %v5951_v16 = vunpack.c.l.bf16 %v5950_v54  ;;  %v5952_v20 = vunpack.c.h.bf16 %v5936_v46  ;;  %v2375_v34 = vadd.f32 %v2374_v62, %v2373_v31  ;;  %v5102_v30 = vld [vmem:[%s4211_s11 + $0x228] sm:$0xff]  }
 0x17b   : > { %v2267_v13 = vadd.f32 %v2266_v51, %v2265_v17  ;;  %v2590_v44 = vsel %vm382_vm0, %v2170_v7, 0.0  ;;  %v2482_v2 = vsel %vm382_vm0, %v2121_v39, 0.0  ;;  %v5954_v35 = vunpack.c.l.bf16 %v5953_v21  ;;  %v656_v7 = vld [vmem:[%s3983_s23 + $0x240] sm:$0xff]  ;;  %1592 = vperm.xlu1 %3786, %v705_v18  }
 0x17c   : > { %v2047_v45 = vmul.f32 %v5949_v8, %v4899_v29  ;;  %v2073_v52 = vmul.f32 %v5951_v16, %v1428_v59  ;;  %v2024_v26 = vmul.f32 %v5952_v20, %v1183_v15  ;;  %v5955_v29 = vunpack.c.h.bf16 %v5948_v63  ;;  %1347 = vperm.xlu0 %3785, %v656_v7   ;;  %v754_v63 = vld [vmem:[%s3983_s23 + $0x550] sm:$0xff]  ;;  %v5093_v8 = vld [vmem:[%s4211_s11 + $0xa0] sm:$0xff]  }
 0x17d   : > { %v2097_v32 = vmul.f32 %v5954_v35, %v1548_v43  ;;  %v2589_v33 = vadd.f32 %v2588_v14, %v2587_v48  ;;  %v2481_v31 = vadd.f32 %v2480_v5, %v2479_v38  ;;  %v2427_v43 = vsel %vm382_vm0, %v2096_v56, 0.0  ;;  %v1308_v51 = vpop.permute.xlu0 %1307  ;;  %v607_v5 = vld [vmem:[%s3983_s23 + $0xb8] sm:$0xff]  ;;  %v5124_v18 = vld [vmem:[%s4211_s11 + $0x40] sm:$0xff]  }
 0x17e   : > { %v2048_v12 = vmul.f32 %v5955_v29, %v1303_v55  ;;  %v2376_v1 = vsel %vm382_vm0, %v2073_v52, 0.0  ;;  %v2268_v46 = vsel %vm382_vm0, %v2024_v26, 0.0  ;;  %v2319_v47 = vsel %vm382_vm0, %v2047_v45, 0.0  ;;  %v5956_v55 = vld [vmem:[#allocation16_spill] sm:$0xff] }
 0x17f   : > { %v5062_v17 = vadd.f32 %v2376_v1, %v2375_v34  ;;  %v5064_v3 = vadd.f32 %v2268_v46, %v2267_v13  ;;  %v5957_v36 = vunpack.c.l.bf16 %v5956_v55  ;;  %v5958_v6 = vunpack.c.h.bf16 %v5945_v27  ;;  %1102 = vperm.xlu1 %3786, %v607_v5  }
 0x180   : > { %v2426_v38 = vadd.f32 %v5005_v24, %v4982_v41  ;;  %v2318_v61 = vadd.f32 %v2317_v50, %v4984_v57  ;;  %v2591_v19 = vadd.f32 %v2590_v44, %v2589_v33  ;;  %v2483_v42 = vadd.f32 %v2482_v2, %v2481_v31  ;;  %v1553_v50 = vpop.permute.xlu1 %1552  ;;  %1837 = vperm.xlu0 %3785, %v754_v63   ;;  %v681_v2 = vld [vmem:[%s3983_s23 + $0x308] sm:$0xff]  ;;  %v682_v63 = vld [vmem:[%s3983_s23 + $0x310] sm:$0xff] }
 0x181   : > { %v2171_v60 = vmul.f32 %v5957_v36, %v1918_v4  ;;  %v2122_v48 = vmul.f32 %v5958_v6, %v1673_v10  ;;  %v2429_v39 = vsel %vm382_vm0, %v2097_v32, 0.0  ;;  %v2321_v23 = vsel %vm382_vm0, %v2048_v12, 0.0  ;;  %v1798_v26 = vpop.permute.xlu0 %1797  ;;  %v779_v4 = vld [vmem:[%s3983_s23 + $0x618] sm:$0xff]  ;;  %v730_v10 = vld [vmem:[%s3983_s23 + $0x490] sm:$0xff] }
 0x182   : > { %v2428_v62 = vadd.f32 %v2427_v43, %v2426_v38  ;;  %v2320_v41 = vadd.f32 %v2319_v47, %v2318_v61  ;;  %v5959_v40 = vunpack.c.h.bf16 %v5953_v21  ;;  %v2049_v14 = vmul.f32 %v3181_v22, %v1308_v51  ;;  %v5113_v43 = vld [vmem:[%s4211_s11 + $0x1c8] sm:$0xff]   ;;  %v755_v51 = vld [vmem:[%s3983_s23 + $0x558] sm:$0xff] }
 0x183   : > { %v2592_v27 = vsel %vm382_vm0, %v2171_v60, 0.0  ;;  %v2484_v49 = vsel %vm382_vm0, %v2122_v48, 0.0  ;;  %v3082_v0 = vunpack.c.h.bf16 %v5941_v58  ;;  %v3377_v56 = vunpack.c.l.bf16 %v5078_v53  ;;  %1472 = vperm.xlu1 %3786, %v681_v2  }
 0x184   : > { %v2593_v57 = vadd.f32 %v2592_v27, %v2591_v19  ;;  %v2485_v24 = vadd.f32 %v2484_v49, %v2483_v42  ;;  %v2098_v11 = vmul.f32 %v5959_v40, %v1553_v50  ;;  %v2430_v59 = vadd.f32 %v2429_v39, %v2428_v62  ;;  %v1063_v20 = vpop.permute.xlu1 %1062  ;;  %1227 = vperm.xlu0 %3785, %v632_v37   ;;  %v706_v19 = vld [vmem:[%s3983_s23 + $0x3d0] sm:$0xff]  ;;  %v657_v42 = vld [vmem:[%s3983_s23 + $0x248] sm:$0xff]  ;;  %v608_v50 = vld [vmem:[%s3983_s23 + $0xc0] sm:$0xff] }
 0x185   : > { %v2322_v15 = vadd.f32 %v2321_v23, %v2320_v41  ;;  %v2323_v16 = vsel %vm382_vm0, %v2049_v14, 0.0  ;;  %v2000_v58 = vmul.f32 %v3082_v0, %v1063_v20  ;;  %v2147_v34 = vmul.f32 %v3377_v56, %v1798_v26  ;;  %v1188_v1 = vpop.permute.xlu0 %1187  ;;  %v5133_v40 = vld [vmem:[%s4211_s11 + $0x168] sm:$0xff]   ;;  %v780_v37 = vld [vmem:[%s3983_s23 + $0x620] sm:$0xff] }
 0x186   : > { %v2431_v45 = vsel %vm382_vm0, %v2098_v11, 0.0  ;;  %v3230_v13 = vunpack.c.h.bf16 %v5950_v54  ;;  %v3133_v44 = vunpack.c.l.bf16 %v5093_v8  ;;  %v3426_v33 = vunpack.c.h.bf16 %v5956_v55 }
 0x187   : > { %v2432_v22 = vadd.f32 %v2431_v45, %v2430_v59  ;;  %v2324_v52 = vadd.f32 %v2323_v16, %v2322_v15  ;;  %v2215_v21 = vsel %vm382_vm0, %v2000_v58, 0.0  ;;  %v2539_v35 = vsel %vm382_vm0, %v2147_v34, 0.0  ;;  %1962 = vperm.xlu1 %3786, %v779_v4   ;;  %v633_v45 = vld [vmem:[%s3983_s23 + $0x188] sm:$0xff]  ;;  %v5142_v16 = vld [vmem:[%s4211_s11 + $0x2f0] sm:$0xff]  }
 0x188   : > { %v2216_v32 = vadd.f32 %v2215_v21, %v5040_v25  ;;  %v2540_v29 = vadd.f32 %v2539_v35, %v5042_v9  ;;  %v1433_v12 = vpop.permute.xlu1 %1432  ;;  %v2025_v46 = vmul.f32 %v3133_v44, %v1188_v1  ;;  %v3329_v31 = vunpack.c.l.bf16 %v5102_v30  ;;  %1717 = vperm.xlu0 %3785, %v730_v10   ;;  %v731_v21 = vld [vmem:[%s3983_s23 + $0x498] sm:$0xff]  ;;  %v5151_v35 = vld [vmem:[%s4211_s11 + $0x108] sm:$0xff]  }
 0x189   : > { %v2074_v54 = vmul.f32 %v3230_v13, %v1433_v12  ;;  %v1678_v6 = vpop.permute.xlu0 %1677  ;;  %v3281_v38 = vunpack.c.l.bf16 %v5113_v43  ;;  %v3182_v61 = vunpack.c.h.bf16 %v4830_v28  ;;  %v3085_v28 = vunpack.c.l.bf16 %v5124_v18  ;;  %v707_v10 = vld [vmem:[%s3983_s23 + $0x3d8] sm:$0xff] }
 0x18a   : > { %v2270_v9 = vsel %vm382_vm0, %v2025_v46, 0.0  ;;  %v2123_v48 = vmul.f32 %v3329_v31, %v1678_v6  ;;  %v3378_v41 = vunpack.c.h.bf16 %v5078_v53  ;;  %v3233_v53 = vunpack.c.l.bf16 %v5133_v40 }
 0x18b   : > { %v2378_v25 = vsel %vm382_vm0, %v2074_v54, 0.0  ;;  %v2271_v36 = vadd.f32 %v2270_v9, %v5064_v3  ;;  %1597 = vperm.xlu1 %3786, %v706_v19   ;;  %v3134_v5 = vunpack.c.h.bf16 %v5093_v8  ;;  %v3429_v8 = vunpack.c.l.bf16 %v5142_v16  ;;  %v5160_v9 = vld [vmem:[%s4211_s11 + $0x290] sm:$0xff]  }
 0x18c   : > { %v2379_v47 = vadd.f32 %v2378_v25, %v5062_v17  ;;  %v1923_v60 = vpop.permute.xlu1 %1922  ;;  %v2486_v3 = vsel %vm382_vm0, %v2123_v48, 0.0  ;;  %1352 = vperm.xlu0 %3785, %v657_v42   ;;  %v3330_v2 = vunpack.c.h.bf16 %v5102_v30  ;;  %v3282_v30 = vunpack.c.h.bf16 %v5113_v43  ;;  %v658_v25 = vld [vmem:[%s3983_s23 + $0x250] sm:$0xff]  ;;  %v683_v42 = vld [vmem:[%s3983_s23 + $0x318] sm:$0xff] }
 0x18d   : > { %v2172_v55 = vmul.f32 %v3426_v33, %v1923_v60  ;;  %v2487_v39 = vadd.f32 %v2486_v3, %v2485_v24  ;;  %v1313_v27 = vpop.permute.xlu0 %1312  ;;  %v3185_v4 = vunpack.c.l.bf16 %v5151_v35  ;;  %v3086_v43 = vunpack.c.h.bf16 %v5124_v18  ;;  %v5169_v3 = vld [vmem:[%s4211_s11 + $0xa8] sm:$0xff]  }
 0x18e   : > { %v2050_v62 = vmul.f32 %v3182_v61, %v1313_v27  ;;  %v3381_v19 = vunpack.c.l.bf16 %v5160_v9  ;;  %v3234_v18 = vunpack.c.h.bf16 %v5133_v40  ;;  %v3430_v40 = vunpack.c.h.bf16 %v5142_v16 }
 0x18f   : > { %v2594_v17 = vsel %vm382_vm0, %v2172_v55, 0.0  ;;  %1107 = vperm.xlu1 %3786, %v608_v50   ;;  %v3137_v50 = vunpack.c.l.bf16 %v5169_v3 }
 0x190   : > { %v2595_v7 = vadd.f32 %v2594_v17, %v2593_v57  ;;  %v1558_v23 = vpop.permute.xlu1 %1557  ;;  %v2325_v24 = vsel %vm382_vm0, %v2050_v62, 0.0  ;;  %1842 = vperm.xlu0 %3785, %v755_v51   ;;  %v756_v17 = vld [vmem:[%s3983_s23 + $0x560] sm:$0xff]  ;;  %v781_v51 = vld [vmem:[%s3983_s23 + $0x628] sm:$0xff] }
 0x191   : > { %v2099_v49 = vmul.f32 %v3281_v38, %v1558_v23  ;;  %v2326_v14 = vadd.f32 %v2325_v24, %v2324_v52  ;;  %v1803_v56 = vpop.permute.xlu0 %1802  ;;  %v5178_v24 = vld [vmem:[%s4211_s11 + $0x230] sm:$0xff]  }
 0x192   : > { %v2148_v15 = vmul.f32 %v3378_v41, %v1803_v56 }
 0x193   : > { %v2433_v57 = vsel %vm382_vm0, %v2099_v49, 0.0  ;;  %1477 = vperm.xlu1 %3786, %v682_v63   ;;  %v3333_v63 = vunpack.c.l.bf16 %v5178_v24 }
 0x194   : > { %v2434_v11 = vadd.f32 %v2433_v57, %v2432_v22  ;;  %v1068_v0 = vpop.permute.xlu1 %1067  ;;  %v2541_v52 = vsel %vm382_vm0, %v2148_v15, 0.0  ;;  %1232 = vperm.xlu0 %3785, %v633_v45   ;;  %v732_v57 = vld [vmem:[%s3983_s23 + $0x4a0] sm:$0xff]  ;;  %v757_v45 = vld [vmem:[%s3983_s23 + $0x568] sm:$0xff] }
 0x195   : > { %v2001_v59 = vmul.f32 %v3085_v28, %v1068_v0  ;;  %v2542_v26 = vadd.f32 %v2541_v52, %v2540_v29  ;;  %v1193_v34 = vpop.permute.xlu0 %1192  ;;  %v5187_v52 = vld [vmem:[%s4211_s11 + $0x1d0] sm:$0xff]  }
 0x196   : > { %v2026_v44 = vmul.f32 %v3134_v5, %v1193_v34  ;;  %v3285_v16 = vunpack.c.l.bf16 %v5187_v52 }
 0x197   : > { %v2217_v22 = vsel %vm382_vm0, %v2001_v59, 0.0  ;;  %1967 = vperm.xlu1 %3786, %v780_v37   ;;  %v3186_v37 = vunpack.c.h.bf16 %v5151_v35 }
 0x198   : > { %v2218_v20 = vadd.f32 %v2217_v22, %v2216_v32  ;;  %v1438_v58 = vpop.permute.xlu1 %1437  ;;  %v2272_v29 = vsel %vm382_vm0, %v2026_v44, 0.0  ;;  %1722 = vperm.xlu0 %3785, %v731_v21   ;;  %v708_v22 = vld [vmem:[%s3983_s23 + $0x3e0] sm:$0xff]  ;;  %v782_v21 = vld [vmem:[%s3983_s23 + $0x630] sm:$0xff] }
 0x199   : > { %v2075_v13 = vmul.f32 %v3233_v53, %v1438_v58  ;;  %v2273_v1 = vadd.f32 %v2272_v29, %v2271_v36  ;;  %v1683_v46 = vpop.permute.xlu0 %1682  ;;  %v5196_v29 = vld [vmem:[%s4211_s11 + $0x48] sm:$0xff]  }
 0x19a   : > { %v2124_v31 = vmul.f32 %v3330_v2, %v1683_v46  ;;  %v3089_v35 = vunpack.c.l.bf16 %v5196_v29 }
 0x19b   : > { %v2380_v32 = vsel %vm382_vm0, %v2075_v13, 0.0  ;;  %1602 = vperm.xlu1 %3786, %v707_v10   ;;  %v3382_v10 = vunpack.c.h.bf16 %v5160_v9 }
 0x19c   : > { %v2381_v12 = vadd.f32 %v2380_v32, %v2379_v47  ;;  %v1928_v54 = vpop.permute.xlu1 %1927  ;;  %v2488_v36 = vsel %vm382_vm0, %v2124_v31, 0.0  ;;  %1357 = vperm.xlu0 %3785, %v658_v25   ;;  %v733_v32 = vld [vmem:[%s3983_s23 + $0x4a8] sm:$0xff]  ;;  %v783_v25 = vld [vmem:[%s3983_s23 + $0x638] sm:$0xff] }
 0x19d   : > { %v2173_v33 = vmul.f32 %v3429_v8, %v1928_v54  ;;  %v2489_v6 = vadd.f32 %v2488_v36, %v2487_v39  ;;  %v1318_v48 = vpop.permute.xlu0 %1317  ;;  %v5205_v36 = vld [vmem:[%s4211_s11 + $0x170] sm:$0xff]  }
 0x19e   : > { %v2051_v61 = vmul.f32 %v3185_v4, %v1318_v48  ;;  %v3237_v9 = vunpack.c.l.bf16 %v5205_v36 }
 0x19f   : > { %v2596_v47 = vsel %vm382_vm0, %v2173_v33, 0.0  ;;  %1482 = vperm.xlu1 %3786, %v683_v42   ;;  %v3138_v42 = vunpack.c.h.bf16 %v5169_v3 }
 0x1a0   : > { %v2597_v60 = vadd.f32 %v2596_v47, %v2595_v7  ;;  %v1563_v55 = vpop.permute.xlu1 %1562  ;;  %v2327_v39 = vsel %vm382_vm0, %v2051_v61, 0.0  ;;  %1847 = vperm.xlu0 %3785, %v756_v17   ;;  %v758_v47 = vld [vmem:[%s3983_s23 + $0x570] sm:$0xff]  ;;  %v5212_v17 = vld [vmem:[%s4211_s11 + $0x2f8] sm:$0xff]   ;;  %s3038_s23 = sshll.u32 %s351_s22, 3 }
 0x1a1   : > { %v2100_v38 = vmul.f32 %v3282_v30, %v1563_v55  ;;  %v2328_v27 = vadd.f32 %v2327_v39, %v2326_v14  ;;  %v1808_v62 = vpop.permute.xlu0 %1807  ;;  %s353_s12 = scalar_lea.vmem [#allocation3], %s3038_s23  ;;  %s3795_s23 = sshll.u32 %s3875_s30, 4  ;;  %s3796_s23 = int_to_ptr.vmem [resolvable:$false] %s3795_s23 }
 0x1a2   : > { %v2149_v41 = vmul.f32 %v3381_v19, %v1808_v62  ;;  %s2942_s14 = sshll.u32 %s353_s12, 4  ;;  %s3797_s24 = scalar_lea.vmem %s3796_s23, 256  ;;  %s5586_s14 = int_to_ptr.vmem [resolvable:$true] %s2942_s14 }
 0x1a3   : > { %v2435_v7 = vsel %vm382_vm0, %v2100_v38, 0.0  ;;  %1972 = vperm.xlu1 %3786, %v781_v51   ;;  %v5219_v51 = vld [vmem:[%s4211_s11 + $0x110] sm:$0xff]   ;;  %s3791_s21 = scalar_lea.vmem %s5586_s14, 128  ;;  %p3798_p1 = scmp.lt.s32.totalorder %s5586_s14, %s3796_s23 }
 0x1a4   : > { %v2436_v23 = vadd.f32 %v2435_v7, %v2434_v11  ;;  %v1073_v49 = vpop.permute.xlu1 %1072  ;;  %v2543_v14 = vsel %vm382_vm0, %v2149_v41, 0.0  ;;  %1727 = vperm.xlu0 %3785, %v732_v57   ;;  %p3792_p12 = scmp.ne.s32.totalorder %s5586_s14, %s3791_s21  ;;  %p3799_p2 = scmp.lt.s32.totalorder %s3797_s24, %s3791_s21 }
 0x1a5   : > { %v2002_v28 = vmul.f32 %v3086_v43, %v1073_v49  ;;  %v2544_v56 = vadd.f32 %v2543_v14, %v2542_v26  ;;  %v1198_v15 = vpop.permute.xlu0 %1197 }
 0x1a6   : > { %v2027_v5 = vmul.f32 %v3137_v50, %v1198_v15  ;;  %v3334_v50 = vunpack.c.h.bf16 %v5178_v24  ;;  %p3793_p13 = pnand %p3792_p12, %p3961_p4  ;;  %p3800_p3 = por %p3799_p2, %p3798_p1 }
 0x1a7   : > { %v2219_v11 = vsel %vm382_vm0, %v2002_v28, 0.0  ;;  %1852 = vperm.xlu1 %3786, %v757_v45  }
 0x1a8   : > { %v2220_v0 = vadd.f32 %v2219_v11, %v2218_v20  ;;  %v1443_v59 = vpop.permute.xlu1 %1442  ;;  %v2274_v26 = vsel %vm382_vm0, %v2027_v5, 0.0  ;;  %1607 = vperm.xlu0 %3785, %v708_v22   ;;  %v3189_v5 = vunpack.c.l.bf16 %v5219_v51  ;;  %p3794_p0 = pneg %p3793_p13 }
 0x1a9   : > { %v2076_v53 = vmul.f32 %v3234_v18, %v1443_v59  ;;  %v2275_v34 = vadd.f32 %v2274_v26, %v2273_v1  ;;  %v1688_v44 = vpop.permute.xlu0 %1687  ;;  %v3433_v18 = vunpack.c.l.bf16 %v5212_v17 }
 0x1aa   : > { %v2125_v2 = vmul.f32 %v3333_v63, %v1688_v44  ;;  %p3801_p5 = pnand %p3800_p3, %p3794_p0 }
 0x1ab   : > { %v2382_v20 = vsel %vm382_vm0, %v2076_v53, 0.0  ;;  %1977 = vperm.xlu1 %3786, %v782_v21   ;;  %v3286_v53 = vunpack.c.h.bf16 %v5187_v52  ;;  %v3090_v52 = vunpack.c.h.bf16 %v5196_v29 }
 0x1ac   : > { %v2383_v58 = vadd.f32 %v2382_v20, %v2381_v12  ;;  %v1933_v13 = vpop.permute.xlu1 %1932  ;;  %v2490_v1 = vsel %vm382_vm0, %v2125_v2, 0.0  ;;  %1732 = vperm.xlu0 %3785, %v733_v32  }
 0x1ad   : > { %v2174_v8 = vmul.f32 %v3430_v40, %v1933_v13  ;;  %v2491_v46 = vadd.f32 %v2490_v1, %v2489_v6  ;;  %v1323_v31 = vpop.permute.xlu0 %1322  ;;  %v5226_v40 = vld [vmem:[%s4211_s11 + $0x298] sm:$0xff]  }
 0x1ae   : > { %v2052_v4 = vmul.f32 %v3186_v37, %v1323_v31  ;;  %v3385_v44 = vunpack.c.l.bf16 %v5226_v40 }
 0x1af   : > { %v2598_v12 = vsel %vm382_vm0, %v2174_v8, 0.0  ;;  %1982 = vperm.xlu1 %3786, %v783_v25   ;;  %v5235_v8 = vld [vmem:[%s4211_s11 + $0xb0] sm:$0xff]  }
 0x1b0   : > { %v2599_v54 = vadd.f32 %v2598_v12, %v2597_v60  ;;  %v1568_v33 = vpop.permute.xlu1 %1567  ;;  %v2329_v60 = vsel %vm382_vm0, %v2052_v4, 0.0  ;;  %1857 = vperm.xlu0 %3785, %v758_v47   ;;  %v3141_v29 = vunpack.c.l.bf16 %v5235_v8  ;;  %v2655_v4 = vld [vmem:[%s5633_s2] sm:$0xff] }
 0x1b1   : > { %v2101_v30 = vmul.f32 %v3285_v16, %v1568_v33  ;;  %v2330_v48 = vadd.f32 %v2329_v60, %v2328_v27  ;;  %v1813_v61 = vpop.permute.xlu0 %1812  ;;  %v5246_v33 = vld [vmem:[%s4211_s11 + $0x238] sm:$0xff]   ;;  %v3873_v60 = vmov 0.0|0.0  }
 0x1b2   : > { %v2150_v19 = vmul.f32 %v3382_v10, %v1813_v61  ;;  %v2657_v10 = vld [vmem:[%s5633_s2 + $0x10] sm:$0xff]  ;;  %3670 = vmatprep.subr.bf16.mxu0 %v3873_v60  ;;  %3676 = vmatprep.subr.bf16.mxu1 %v3873_v60 }
 0x1b3   : > { %v2437_v55 = vsel %vm382_vm0, %v2101_v30, 0.0 }
 0x1b4   : > { %v2438_v6 = vadd.f32 %v2437_v55, %v2436_v23  ;;  %v1078_v38 = vpop.permute.xlu1 %1077  ;;  %v2545_v39 = vsel %vm382_vm0, %v2150_v19, 0.0  ;;  %v3337_v19 = vunpack.c.l.bf16 %v5246_v33 }
 0x1b5   : > { %v2003_v43 = vmul.f32 %v3089_v35, %v1078_v38  ;;  %v2546_v23 = vadd.f32 %v2545_v39, %v2544_v56  ;;  %v1203_v62 = vpop.permute.xlu0 %1202  ;;  %v2656_v35 = vld [vmem:[%s5633_s2 + $0x8] sm:$0xff] }
 0x1b6   : > { %v2028_v41 = vmul.f32 %v3138_v42, %v1203_v62 }
 0x1b7   : > { %v2221_v7 = vsel %vm382_vm0, %v2003_v43, 0.0  ;;  %v3434_v43 = vunpack.c.h.bf16 %v5212_v17 }
 0x1b8   : > { %v2222_v49 = vadd.f32 %v2221_v7, %v2220_v0  ;;  %v1448_v27 = vpop.permute.xlu1 %1447  ;;  %v2276_v57 = vsel %vm382_vm0, %v2028_v41, 0.0 }
 0x1b9   : > { %v2077_v28 = vmul.f32 %v3237_v9, %v1448_v27  ;;  %v2277_v14 = vadd.f32 %v2276_v57, %v2275_v34  ;;  %v1693_v0 = vpop.permute.xlu0 %1692  ;;  %v5271_v9 = vld [vmem:[%s4211_s11 + $0x1d8] sm:$0xff]  }
 0x1ba   : > { %v2126_v15 = vmul.f32 %v3334_v50, %v1693_v0  ;;  %v3289_v41 = vunpack.c.l.bf16 %v5271_v9  ;;  %v5283_v50 = vld [vmem:[%s4211_s11 + $0x50] sm:$0xff]  }
 0x1bb   : > { %v2384_v3 = vsel %vm382_vm0, %v2077_v28, 0.0 }
 0x1bc   : > { %v2385_v11 = vadd.f32 %v2384_v3, %v2383_v58  ;;  %v1938_v59 = vpop.permute.xlu1 %1937  ;;  %v2492_v63 = vsel %vm382_vm0, %v2126_v15, 0.0  ;;  %v3872_v58 = vmov 0.0  }
 0x1bd   : > { %v2175_v56 = vmul.f32 %v3433_v18, %v1938_v59  ;;  %v2493_v22 = vadd.f32 %v2492_v63, %v2491_v46  ;;  %v1328_v26 = vpop.permute.xlu0 %1327  ;;  %383 = vst.msk [vmem:[#allocation2] sm:$0xff] %vm382_vm0, %v3872_v58  ;;  %v3238_v46 = vunpack.c.h.bf16 %v5205_v36  ;;  %3597 = vmatprep.mubr.msk.f32.mxu0 %vm3874_vm1, %v3872_v58  ;;  %3632 = vmatprep.mubr.msk.f32.mxu1 %vm3874_vm1, %v3872_v58  ;;  %v3190_v18 = vunpack.c.h.bf16 %v5219_v51  ;;  %v2741_v63 = vld [vmem:[%s5635_s4 + $0x8] sm:$0xff] }
 0x1be   : > { %v2053_v13 = vmul.f32 %v3189_v5, %v1328_v26  ;;  %v3386_v51 = vunpack.c.h.bf16 %v5226_v40  ;;  %v5295_v5 = vld [vmem:[%s4211_s11 + $0x178] sm:$0xff]  }
 0x1bf   : > { %v2600_v24 = vsel %vm382_vm0, %v2175_v56, 0.0  ;;  %v2743_v26 = vld [vmem:[%s5635_s4 + $0x18] sm:$0xff] }
 0x1c0   : > { %v2601_v45 = vadd.f32 %v2600_v24, %v2599_v54  ;;  %v1573_v20 = vpop.permute.xlu1 %1572  ;;  %v2331_v16 = vsel %vm382_vm0, %v2053_v13, 0.0  ;;  %v2740_v24 = vld [vmem:[%s5635_s4] sm:$0xff] }
 0x1c1   : > { %v2102_v34 = vmul.f32 %v3286_v53, %v1573_v20  ;;  %v5241_v21 = vadd.f32 %v2331_v16, %v2330_v48  ;;  %v1818_v12 = vpop.permute.xlu0 %1817  ;;  %v2658_v48 = vld [vmem:[%s5633_s2 + $0x18] sm:$0xff]  ;;  %v3093_v53 = vunpack.c.l.bf16 %v5283_v50  ;;  %v3677_v40 = vpack.c.bf16 %v2741_v63, %v2740_v24 }
 0x1c2   : > { %v2151_v54 = vmul.f32 %v3385_v44, %v1818_v12  ;;  %v3674_v42 = vpack.c.bf16 %v2658_v48, %v2657_v10  ;;  %v3142_v12 = vunpack.c.h.bf16 %v5235_v8  ;;  %v5340_v48 = vld [vmem:[%s4211_s11 + $0x118] sm:$0xff]  }
 0x1c3   : > { %v2439_v2 = vsel %vm382_vm0, %v2102_v34, 0.0  ;;  %3678 = vmatpush3.bf16.msra.mxu1 %v3677_v40  ;;  %v5370_v24 = vld [vmem:[%s4211_s11 + $0xb8] sm:$0xff]  }
 0x1c4   : > { %v5239_v37 = vadd.f32 %v2439_v2, %v2438_v6  ;;  %v1083_v32 = vpop.permute.xlu1 %1082  ;;  %v2547_v30 = vsel %vm382_vm0, %v2151_v54, 0.0  ;;  %v3671_v6 = vpack.c.bf16 %v2656_v35, %v2655_v4  ;;  %v3241_v2 = vunpack.c.l.bf16 %v5295_v5  ;;  %3679 = vmatprep.subr.bf16.mxu1 %v3873_v60 }
 0x1c5   : > { %v2004_v1 = vmul.f32 %v3090_v52, %v1083_v32  ;;  %v5261_v47 = vadd.f32 %v2547_v30, %v2546_v23  ;;  %v1208_v55 = vpop.permute.xlu0 %1207 }
 0x1c6   : > { %v2029_v61 = vmul.f32 %v3141_v29, %v1208_v55  ;;  %3672 = vmatpush3.bf16.msra.mxu0 %v3671_v6  ;;  %v3338_v55 = vunpack.c.h.bf16 %v5246_v33 }
 0x1c7   : > { %v2223_v31 = vsel %vm382_vm0, %v2004_v1, 0.0  ;;  %3673 = vmatprep.subr.bf16.mxu0 %v3873_v60  ;;  %v5320_v1 = vld [vmem:[%s4211_s11 + $0x300] sm:$0xff]  }
 0x1c8   : > { %v5259_v25 = vadd.f32 %v2223_v31, %v2222_v49  ;;  %v1453_v36 = vpop.permute.xlu1 %1452  ;;  %v2278_v39 = vsel %vm382_vm0, %v2029_v61, 0.0  ;;  %v3437_v35 = vunpack.c.l.bf16 %v5320_v1 }
 0x1c9   : > { %v2078_v38 = vmul.f32 %v3238_v46, %v1453_v36  ;;  %v2279_v23 = vadd.f32 %v2278_v39, %v2277_v14  ;;  %v1698_v27 = vpop.permute.xlu0 %1697 }
 0x1ca   : > { %v2127_v28 = vmul.f32 %v3337_v19, %v1698_v27  ;;  %3675 = vmatpush3.bf16.msra.mxu0 %v3674_v42  ;;  %v3193_v27 = vunpack.c.l.bf16 %v5340_v48 }
 0x1cb   : > { %v2386_v7 = vsel %vm382_vm0, %v2078_v38, 0.0  ;;  %3700 = vmatprep.subr.bf16.mxu0 %v3873_v60 }
 0x1cc   : > { %v2387_v49 = vadd.f32 %v2386_v7, %v2385_v11  ;;  %v1943_v17 = vpop.permute.xlu1 %1942  ;;  %v2494_v57 = vsel %vm382_vm0, %v2127_v28, 0.0  ;;  %v3290_v7 = vunpack.c.h.bf16 %v5271_v9  ;;  %v5354_v28 = vld [vmem:[%s4211_s11 + $0x2a0] sm:$0xff]  }
 0x1cd   : > { %v2176_v62 = vmul.f32 %v3434_v43, %v1943_v17  ;;  %v5290_v14 = vadd.f32 %v2494_v57, %v2493_v22  ;;  %v1333_v0 = vpop.permute.xlu0 %1332 }
 0x1ce   : > { %v2054_v15 = vmul.f32 %v3190_v18, %v1333_v0  ;;  %v3094_v0 = vunpack.c.h.bf16 %v5283_v50 }
 0x1cf   : > { %v2602_v3 = vsel %vm382_vm0, %v2176_v62, 0.0 }
 0x1d0   : > { %v5288_v11 = vadd.f32 %v2602_v3, %v2601_v45  ;;  %v1578_v59 = vpop.permute.xlu1 %1577  ;;  %v2742_v45 = vld [vmem:[%s5635_s4 + $0x10] sm:$0xff]  ;;  %v2333_v20 = vsel %vm382_vm0, %v2054_v15, 0.0 }
 0x1d1   : > { %v2103_v56 = vmul.f32 %v3289_v41, %v1578_v59  ;;  %v5315_v13 = vadd.f32 %v2333_v20, %v5241_v21  ;;  %v1823_v44 = vpop.permute.xlu0 %1822  ;;  %v3680_v54 = vpack.c.bf16 %v2743_v26, %v2742_v45  ;;  %v2745_v21 = vld [vmem:[%s5635_s4 + $0x28] sm:$0xff]  ;;  %v3242_v26 = vunpack.c.h.bf16 %v5295_v5 }
 0x1d2   : > { %v2152_v32 = vmul.f32 %v3386_v51, %v1823_v44 }
 0x1d3   : > { %v2441_v22 = vsel %vm382_vm0, %v2103_v56, 0.0  ;;  %3681 = vmatpush3.bf16.msra.mxu1 %v3680_v54 }
 0x1d4   : > { %v5312_v34 = vadd.f32 %v2441_v22, %v5239_v37  ;;  %v1088_v52 = vpop.permute.xlu1 %1087  ;;  %v2744_v37 = vld [vmem:[%s5635_s4 + $0x20] sm:$0xff]  ;;  %v2549_v29 = vsel %vm382_vm0, %v2152_v32, 0.0  ;;  %3682 = vmatprep.subr.bf16.mxu1 %v3873_v60 }
 0x1d5   : > { %v2005_v16 = vmul.f32 %v3093_v53, %v1088_v52  ;;  %v5335_v31 = vadd.f32 %v2549_v29, %v5261_v47  ;;  %v1213_v4 = vpop.permute.xlu0 %1212  ;;  %v3683_v6 = vpack.c.bf16 %v2745_v21, %v2744_v37  ;;  %v2747_v47 = vld [vmem:[%s5635_s4 + $0x38] sm:$0xff]  ;;  %v3389_v53 = vunpack.c.l.bf16 %v5354_v28  ;;  %v5386_v32 = vld [vmem:[%s4211_s11 + $0x240] sm:$0xff]  }
 0x1d6   : > { %v2030_v36 = vmul.f32 %v3142_v12, %v1213_v4  ;;  %v3438_v29 = vunpack.c.h.bf16 %v5320_v1 }
 0x1d7   : > { %v2225_v46 = vsel %vm382_vm0, %v2005_v16, 0.0  ;;  %3684 = vmatpush3.bf16.msra.mxu1 %v3683_v6 }
 0x1d8   : > { %v5332_v8 = vadd.f32 %v2225_v46, %v5259_v25  ;;  %v1458_v30 = vpop.permute.xlu1 %1457  ;;  %v2746_v25 = vld [vmem:[%s5635_s4 + $0x30] sm:$0xff]  ;;  %v2280_v61 = vsel %vm382_vm0, %v2030_v36, 0.0  ;;  %3685 = vmatprep.subr.bf16.mxu1 %v3873_v60  ;;  %v5402_v36 = vld [vmem:[%s4211_s11 + $0x1e0] sm:$0xff]  }
 0x1d9   : > { %v2079_v10 = vmul.f32 %v3241_v2, %v1458_v30  ;;  %v2281_v43 = vadd.f32 %v2280_v61, %v2279_v23  ;;  %v1703_v42 = vpop.permute.xlu0 %1702  ;;  %v3686_v62 = vpack.c.bf16 %v2747_v47, %v2746_v25  ;;  %v2749_v23 = vld [vmem:[%s5635_s4 + $0x48] sm:$0xff]  ;;  %v3145_v2 = vunpack.c.l.bf16 %v5370_v24 }
 0x1da   : > { %v2128_v17 = vmul.f32 %v3338_v55, %v1703_v42  ;;  %v3293_v61 = vunpack.c.l.bf16 %v5402_v36  ;;  %v5410_v42 = vld [vmem:[%s4211_s11 + $0x58] sm:$0xff]  }
 0x1db   : > { %v2388_v38 = vsel %vm382_vm0, %v2079_v10, 0.0  ;;  %3687 = vmatpush3.bf16.msra.mxu1 %v3686_v62 }
 0x1dc   : > { %v2389_v33 = vadd.f32 %v2388_v38, %v2387_v49  ;;  %v1948_v19 = vpop.permute.xlu1 %1947  ;;  %v2748_v49 = vld [vmem:[%s5635_s4 + $0x40] sm:$0xff]  ;;  %v2496_v41 = vsel %vm382_vm0, %v2128_v17, 0.0  ;;  %3688 = vmatprep.subr.bf16.mxu1 %v3873_v60 }
 0x1dd   : > { %v2177_v39 = vmul.f32 %v3437_v35, %v1948_v19  ;;  %v2497_v3 = vadd.f32 %v2496_v41, %v5290_v14  ;;  %v1338_v59 = vpop.permute.xlu0 %1337  ;;  %v3689_v51 = vpack.c.bf16 %v2749_v23, %v2748_v49  ;;  %v2751_v14 = vld [vmem:[%s5635_s4 + $0x58] sm:$0xff]  ;;  %v3341_v35 = vunpack.c.l.bf16 %v5386_v32 }
 0x1de   : > { %v2055_v15 = vmul.f32 %v3193_v27, %v1338_v59  ;;  %v3194_v19 = vunpack.c.h.bf16 %v5340_v48  ;;  %v3097_v23 = vunpack.c.l.bf16 %v5410_v42  ;;  %v3390_v48 = vunpack.c.h.bf16 %v5354_v28 }
 0x1df   : > { %v2604_v9 = vsel %vm382_vm0, %v2177_v39, 0.0  ;;  %3690 = vmatpush3.bf16.msra.mxu1 %v3689_v51  ;;  %v3146_v51 = vunpack.c.h.bf16 %v5370_v24 }
 0x1e0   : > { %v2605_v18 = vadd.f32 %v2604_v9, %v5288_v11  ;;  %v1583_v57 = vpop.permute.xlu1 %1582  ;;  %v2750_v11 = vld [vmem:[%s5635_s4 + $0x50] sm:$0xff]  ;;  %v2335_v63 = vsel %vm382_vm0, %v2055_v15, 0.0  ;;  %3691 = vmatprep.subr.bf16.mxu1 %v3873_v60  ;;  %v5418_v9 = vld [vmem:[%s4211_s11 + $0x180] sm:$0xff]  }
 0x1e1   : > { %v2104_v56 = vmul.f32 %v3290_v7, %v1583_v57  ;;  %v2336_v22 = vadd.f32 %v2335_v63, %v5315_v13  ;;  %v1828_v40 = vpop.permute.xlu0 %1827  ;;  %v3692_v16 = vpack.c.bf16 %v2751_v14, %v2750_v11  ;;  %v2753_v13 = vld [vmem:[%s5635_s4 + $0x68] sm:$0xff] }
 0x1e2   : > { %v2153_v44 = vmul.f32 %v3389_v53, %v1828_v40  ;;  %v3245_v53 = vunpack.c.l.bf16 %v5418_v9  ;;  %v5425_v11 = vld [vmem:[%s4211_s11 + $0x308] sm:$0xff]  }
 0x1e3   : > { %v2443_v50 = vsel %vm382_vm0, %v2104_v56, 0.0  ;;  %3693 = vmatpush3.bf16.msra.mxu1 %v3692_v16 }
 0x1e4   : > { %v2444_v45 = vadd.f32 %v2443_v50, %v5312_v34  ;;  %v1093_v20 = vpop.permute.xlu1 %1092  ;;  %v2752_v34 = vld [vmem:[%s5635_s4 + $0x60] sm:$0xff]  ;;  %v2551_v12 = vsel %vm382_vm0, %v2153_v44, 0.0  ;;  %3694 = vmatprep.subr.bf16.mxu1 %v3873_v60 }
 0x1e5   : > { %v2006_v52 = vmul.f32 %v3094_v0, %v1093_v20  ;;  %v2552_v37 = vadd.f32 %v2551_v12, %v5335_v31  ;;  %v1218_v46 = vpop.permute.xlu0 %1217  ;;  %v3695_v10 = vpack.c.bf16 %v2753_v13, %v2752_v34  ;;  %v5432_v44 = vld [vmem:[%s4211_s11 + $0x120] sm:$0xff]  }
 0x1e6   : > { %v2031_v4 = vmul.f32 %v3145_v2, %v1218_v46  ;;  %v5439_v46 = vld [vmem:[%s4211_s11 + $0x2a8] sm:$0xff]  }
 0x1e7   : > { %v2227_v5 = vsel %vm382_vm0, %v2006_v52, 0.0  ;;  %3696 = vmatpush3.bf16.msra.mxu1 %v3695_v10  ;;  %v3342_v52 = vunpack.c.h.bf16 %v5386_v32 }
 0x1e8   : > { %v2228_v54 = vadd.f32 %v2227_v5, %v5332_v8  ;;  %v1463_v21 = vpop.permute.xlu1 %1462  ;;  %v2282_v8 = vsel %vm382_vm0, %v2031_v4, 0.0  ;;  %3697 = vmatprep.subr.bf16.mxu1 %v3873_v60 }
 0x1e9   : > { %v2080_v30 = vmul.f32 %v3242_v26, %v1463_v21  ;;  %v2283_v6 = vadd.f32 %v2282_v8, %v2281_v43  ;;  %v1708_v47 = vpop.permute.xlu0 %1707  ;;  %v3441_v26 = vunpack.c.l.bf16 %v5425_v11  ;;  %v3197_v21 = vunpack.c.l.bf16 %v5432_v44 }
 0x1ea   : > { %v2129_v38 = vmul.f32 %v3341_v35, %v1708_v47 }
 0x1eb   : > { %v2390_v55 = vsel %vm382_vm0, %v2080_v30, 0.0 }
 0x1ec   : > { %v2391_v31 = vadd.f32 %v2390_v55, %v2389_v33  ;;  %v1953_v25 = vpop.permute.xlu1 %1952  ;;  %v2498_v39 = vsel %vm382_vm0, %v2129_v38, 0.0 }
 0x1ed   : > { %v2178_v1 = vmul.f32 %v3438_v29, %v1953_v25  ;;  %v2499_v43 = vadd.f32 %v2498_v39, %v2497_v3  ;;  %v1343_v27 = vpop.permute.xlu0 %1342 }
 0x1ee   : > { %v2056_v49 = vmul.f32 %v3194_v19, %v1343_v27 }
 0x1ef   : > { %v2606_v7 = vsel %vm382_vm0, %v2178_v1, 0.0 }
 0x1f0   : > { %v2607_v33 = vadd.f32 %v2606_v7, %v2605_v18  ;;  %v1588_v17 = vpop.permute.xlu1 %1587  ;;  %v2337_v57 = vsel %vm382_vm0, %v2056_v49, 0.0 }
 0x1f1   : > { %v2105_v62 = vmul.f32 %v3293_v61, %v1588_v17  ;;  %v2338_v0 = vadd.f32 %v2337_v57, %v2336_v22  ;;  %v1833_v18 = vpop.permute.xlu0 %1832 }
 0x1f2   : > { %v2154_v15 = vmul.f32 %v3390_v48, %v1833_v18 }
 0x1f3   : > { %v2445_v41 = vsel %vm382_vm0, %v2105_v62, 0.0 }
 0x1f4   : > { %v2446_v59 = vadd.f32 %v2445_v41, %v2444_v45  ;;  %v1098_v56 = vpop.permute.xlu1 %1097  ;;  %v2553_v14 = vsel %vm382_vm0, %v2154_v15, 0.0 }
 0x1f5   : > { %v2007_v3 = vmul.f32 %v3097_v23, %v1098_v56  ;;  %v2554_v63 = vadd.f32 %v2553_v14, %v2552_v37  ;;  %v1223_v45 = vpop.permute.xlu0 %1222  ;;  %v3294_v37 = vunpack.c.h.bf16 %v5402_v36  ;;  %v5446_v36 = vld [vmem:[%s4211_s11 + $0xc0] sm:$0xff]   ;;  %v5460_v56 = vld [vmem:[%s4211_s11 + $0x1e8] sm:$0xff]  }
 0x1f6   : > { %v2032_v40 = vmul.f32 %v3146_v51, %v1223_v45 }
 0x1f7   : > { %v2229_v28 = vsel %vm382_vm0, %v2007_v3, 0.0 }
 0x1f8   : > { %v2230_v50 = vadd.f32 %v2229_v28, %v2228_v54  ;;  %v1468_v20 = vpop.permute.xlu1 %1467  ;;  %v2284_v2 = vsel %vm382_vm0, %v2032_v40, 0.0 }
 0x1f9   : > { %v2081_v22 = vmul.f32 %v3245_v53, %v1468_v20  ;;  %v2285_v34 = vadd.f32 %v2284_v2, %v2283_v6  ;;  %v1713_v5 = vpop.permute.xlu0 %1712  ;;  %v3393_v6 = vunpack.c.l.bf16 %v5439_v46  ;;  %v3787_v2 = vld [vmem:[%s4211_s11 + $0x60] sm:$0xff]  }
 0x1fa   : > { %v2130_v54 = vmul.f32 %v3342_v52, %v1713_v5 }
 0x1fb   : > { %v2392_v24 = vsel %vm382_vm0, %v2081_v22, 0.0 }
 0x1fc   : > { %v2393_v16 = vadd.f32 %v2392_v24, %v2391_v31  ;;  %v1958_v13 = vpop.permute.xlu1 %1957  ;;  %v2500_v29 = vsel %vm382_vm0, %v2130_v54, 0.0  ;;  %v3098_v31 = vunpack.c.h.bf16 %v5410_v42  ;;  %v5453_v42 = vld [vmem:[%s4211_s11 + $0x248] sm:$0xff]  }
 0x1fd   : > { %v2179_v12 = vmul.f32 %v3441_v26, %v1958_v13  ;;  %v2501_v4 = vadd.f32 %v2500_v29, %v2499_v43  ;;  %v1348_v10 = vpop.permute.xlu0 %1347  ;;  %v3149_v43 = vunpack.c.l.bf16 %v5446_v36  ;;  %v3499_v13 = vld [vmem:[%s4211_s11 + $0x188] sm:$0xff]  }
 0x1fe   : > { %v2057_v8 = vmul.f32 %v3197_v21, %v1348_v10 }
 0x1ff   : > { %v2608_v32 = vsel %vm382_vm0, %v2179_v12, 0.0 }
 0x200   : > { %v2609_v30 = vadd.f32 %v2608_v32, %v2607_v33  ;;  %v1593_v35 = vpop.permute.xlu1 %1592  ;;  %v2339_v47 = vsel %vm382_vm0, %v2057_v8, 0.0  ;;  %v3246_v33 = vunpack.c.h.bf16 %v5418_v9 }
 0x201   : > { %v2106_v55 = vmul.f32 %v3294_v37, %v1593_v35  ;;  %v2340_v38 = vadd.f32 %v2339_v47, %v2338_v0  ;;  %v1838_v19 = vpop.permute.xlu0 %1837  ;;  %v3345_v0 = vunpack.c.l.bf16 %v5453_v42  ;;  %v5475_v35 = vld [vmem:[%s4211_s11 + $0x310] sm:$0xff]  }
 0x202   : > { %v2155_v39 = vmul.f32 %v3393_v6, %v1838_v19 }
 0x203   : > { %v2447_v25 = vsel %vm382_vm0, %v2106_v55, 0.0 }
 0x204   : > { %v2448_v1 = vadd.f32 %v2447_v25, %v2446_v59  ;;  %v1103_v61 = vpop.permute.xlu1 %1102  ;;  %v2555_v27 = vsel %vm382_vm0, %v2155_v39, 0.0  ;;  %v3442_v59 = vunpack.c.h.bf16 %v5425_v11  ;;  %v3198_v11 = vunpack.c.h.bf16 %v5432_v44 }
 0x205   : > { %v2008_v7 = vmul.f32 %v3098_v31, %v1103_v61  ;;  %v2556_v49 = vadd.f32 %v2555_v27, %v2554_v63  ;;  %v1228_v48 = vpop.permute.xlu0 %1227 }
 0x206   : > { %v2033_v57 = vmul.f32 %v3149_v43, %v1228_v48 }
 0x207   : > { %v2231_v17 = vsel %vm382_vm0, %v2008_v7, 0.0 }
 0x208   : > { %v2232_v62 = vadd.f32 %v2231_v17, %v2230_v50  ;;  %v1473_v23 = vpop.permute.xlu1 %1472  ;;  %v2286_v18 = vsel %vm382_vm0, %v2033_v57, 0.0  ;;  %v3297_v50 = vunpack.c.l.bf16 %v5460_v56  ;;  %v3536_v57 = vld [vmem:[%s4211_s11 + $0x2b0] sm:$0xff]  }
 0x209   : > { %v2082_v41 = vmul.f32 %v3246_v33, %v1473_v23  ;;  %v2287_v15 = vadd.f32 %v2286_v18, %v2285_v34  ;;  %v1718_v51 = vpop.permute.xlu0 %1717  ;;  %v3394_v34 = vunpack.c.h.bf16 %v5439_v46  ;;  %v3788_v23 = vld [vmem:[%s4211_s11 + $0x128] sm:$0xff]  }
 0x20a   : > { %v2131_v14 = vmul.f32 %v3345_v0, %v1718_v51  ;;  %v3201_v48 = vunpack.c.l.bf16 %v3788_v23 }
 0x20b   : > { %v2394_v9 = vsel %vm382_vm0, %v2082_v41, 0.0 }
 0x20c   : > { %v2395_v3 = vadd.f32 %v2394_v9, %v2393_v16  ;;  %v1963_v53 = vpop.permute.xlu1 %1962  ;;  %v2502_v20 = vsel %vm382_vm0, %v2131_v14, 0.0  ;;  %v3101_v16 = vunpack.c.l.bf16 %v3787_v2 }
 0x20d   : > { %v2180_v28 = vmul.f32 %v3442_v59, %v1963_v53  ;;  %v2503_v22 = vadd.f32 %v2502_v20, %v2501_v4  ;;  %v1353_v26 = vpop.permute.xlu0 %1352  ;;  %v3150_v4 = vunpack.c.h.bf16 %v5446_v36 }
 0x20e   : > { %v2058_v24 = vmul.f32 %v3198_v11, %v1353_v26 }
 0x20f   : > { %v2610_v63 = vsel %vm382_vm0, %v2180_v28, 0.0 }
 0x210   : > { %v2611_v45 = vadd.f32 %v2610_v63, %v2609_v30  ;;  %v1598_v40 = vpop.permute.xlu1 %1597  ;;  %v2341_v44 = vsel %vm382_vm0, %v2058_v24, 0.0  ;;  %v3249_v30 = vunpack.c.l.bf16 %v3499_v13  ;;  %v3524_v63 = vld [vmem:[%s4211_s11 + $0x250] sm:$0xff]  }
 0x211   : > { %v2107_v52 = vmul.f32 %v3297_v50, %v1598_v40  ;;  %v2342_v54 = vadd.f32 %v2341_v44, %v2340_v38  ;;  %v1843_v21 = vpop.permute.xlu0 %1842  ;;  %v3346_v38 = vunpack.c.h.bf16 %v5453_v42  ;;  %v3250_v50 = vunpack.c.h.bf16 %v3499_v13 }
 0x212   : > { %v2156_v29 = vmul.f32 %v3394_v34, %v1843_v21  ;;  %v3349_v44 = vunpack.c.l.bf16 %v3524_v63  ;;  %v3350_v23 = vunpack.c.h.bf16 %v3524_v63 }
 0x213   : > { %v2449_v5 = vsel %vm382_vm0, %v2107_v52, 0.0 }
 0x214   : > { %v2450_v12 = vadd.f32 %v2449_v5, %v2448_v1  ;;  %v1108_v37 = vpop.permute.xlu1 %1107  ;;  %v2557_v46 = vsel %vm382_vm0, %v2156_v29, 0.0  ;;  %v3445_v1 = vunpack.c.l.bf16 %v5475_v35  ;;  %v3446_v5 = vunpack.c.h.bf16 %v5475_v35 }
 0x215   : > { %v2009_v32 = vmul.f32 %v3101_v16, %v1108_v37  ;;  %v2558_v8 = vadd.f32 %v2557_v46, %v2556_v49  ;;  %v1233_v6 = vpop.permute.xlu0 %1232  ;;  %v3298_v49 = vunpack.c.h.bf16 %v5460_v56  ;;  %v3397_v56 = vunpack.c.l.bf16 %v3536_v57 }
 0x216   : > { %v2034_v47 = vmul.f32 %v3150_v4, %v1233_v6  ;;  %v3398_v35 = vunpack.c.h.bf16 %v3536_v57  ;;  %v3789_v6 = vld [vmem:[%s4211_s11 + $0x1f0] sm:$0xff]  }
 0x217   : > { %v2233_v10 = vsel %vm382_vm0, %v2009_v32, 0.0 }
 0x218   : > { %v2234_v55 = vadd.f32 %v2233_v10, %v2232_v62  ;;  %v1478_v31 = vpop.permute.xlu1 %1477  ;;  %v2288_v19 = vsel %vm382_vm0, %v2034_v47, 0.0 }
 0x219   : > { %v2083_v25 = vmul.f32 %v3249_v30, %v1478_v31  ;;  %v2289_v33 = vadd.f32 %v2288_v19, %v2287_v15  ;;  %v1723_v17 = vpop.permute.xlu0 %1722 }
 0x21a   : > { %v2235_v61 = vrot.slane %v2234_v55, 4  ;;  %v2132_v62 = vmul.f32 %v3346_v38, %v1723_v17 }
 0x21b   : > { %v2396_v36 = vsel %vm382_vm0, %v2083_v25, 0.0  ;;  %v2290_v42 = vrot.slane %v2289_v33, 4  ;;  %v3301_v25 = vunpack.c.l.bf16 %v3789_v6 }
 0x21c   : > { %v2236_v7 = vadd.f32 %v2235_v61, %v2234_v55  ;;  %v2397_v39 = vadd.f32 %v2396_v36, %v2395_v3  ;;  %v1968_v43 = vpop.permute.xlu1 %1967  ;;  %v2504_v0 = vsel %vm382_vm0, %v2132_v62, 0.0  ;;  %v3549_v61 = vld [vmem:[%s4211_s11 + $0x318] sm:$0xff]  }
 0x21d   : > { %v2181_v27 = vmul.f32 %v3445_v1, %v1968_v43  ;;  %v2291_v18 = vadd.f32 %v2290_v42, %v2289_v33  ;;  %v2505_v15 = vadd.f32 %v2504_v0, %v2503_v22  ;;  %v1358_v51 = vpop.permute.xlu0 %1357 }
 0x21e   : > { %v2237_v41 = vrot.slane %v2236_v7, 2  ;;  %v2059_v14 = vmul.f32 %v3201_v48, %v1358_v51 }
 0x21f   : > { %v2612_v59 = vsel %vm382_vm0, %v2181_v27, 0.0  ;;  %v2292_v11 = vrot.slane %v2291_v18, 2 }
 0x220   : > { %v2238_v9 = vadd.f32 %v2237_v41, %v2236_v7  ;;  %v2613_v3 = vadd.f32 %v2612_v59, %v2611_v45  ;;  %v1603_v53 = vpop.permute.xlu1 %1602  ;;  %v2343_v26 = vsel %vm382_vm0, %v2059_v14, 0.0  ;;  %v3790_v14 = vld [vmem:[%s4211_s11 + $0x2b8] sm:$0xff]  }
 0x221   : > { %v2108_v28 = vmul.f32 %v3298_v49, %v1603_v53  ;;  %v2293_v52 = vadd.f32 %v2292_v11, %v2291_v18  ;;  %v2344_v2 = vadd.f32 %v2343_v26, %v2342_v54  ;;  %v1848_v34 = vpop.permute.xlu0 %1847  ;;  %v3449_v49 = vunpack.c.l.bf16 %v3549_v61 }
 0x222   : > { %v2239_v20 = vrot.slane %v2238_v9, 1  ;;  %v2157_v22 = vmul.f32 %v3397_v56, %v1848_v34 }
 0x223   : > { %v2451_v40 = vsel %vm382_vm0, %v2108_v28, 0.0  ;;  %v2294_v13 = vrot.slane %v2293_v52, 1  ;;  %v2345_v37 = vrot.slane %v2344_v2, 4  ;;  %v3450_v28 = vunpack.c.h.bf16 %v3549_v61 }
 0x224   : > { %v2452_v24 = vadd.f32 %v2451_v40, %v2450_v12  ;;  %v1483_v16 = vpop.permute.xlu1 %1482  ;;  %v2240_v21 = vadd.f32 %v2239_v20, %v2238_v9  ;;  %v2559_v29 = vsel %vm382_vm0, %v2157_v22, 0.0 }
 0x225   : > { %v2084_v45 = vmul.f32 %v3250_v50, %v1483_v16  ;;  %v2295_v30 = vadd.f32 %v2294_v13, %v2293_v52  ;;  %v2346_v12 = vadd.f32 %v2345_v37, %v2344_v2  ;;  %v2560_v4 = vadd.f32 %v2559_v29, %v2558_v8  ;;  %v1728_v46 = vpop.permute.xlu0 %1727 }
 0x226   : > { %v2133_v31 = vmul.f32 %v3349_v44, %v1728_v46  ;;  %v3401_v50 = vunpack.c.l.bf16 %v3790_v14 }
 0x227   : > { %v2398_v32 = vsel %vm382_vm0, %v2084_v45, 0.0  ;;  %v2635_v47 = vsel %vm2634_vm2, %v2295_v30, %v2240_v21  ;;  %v2347_v1 = vrot.slane %v2346_v12, 2 }
 0x228   : > { %v2399_v54 = vadd.f32 %v2398_v32, %v2397_v39  ;;  %v1973_v10 = vpop.permute.xlu1 %1972  ;;  %v2506_v19 = vsel %vm382_vm0, %v2133_v31, 0.0 }
 0x229   : > { %v2182_v55 = vmul.f32 %v3446_v5, %v1973_v10  ;;  %v2348_v7 = vadd.f32 %v2347_v1, %v2346_v12  ;;  %v2507_v39 = vadd.f32 %v2506_v19, %v2505_v15  ;;  %v1608_v17 = vpop.permute.xlu0 %1607 }
 0x22a   : > { %v2400_v38 = vrot.slane %v2399_v54, 4  ;;  %v2109_v62 = vmul.f32 %v3301_v25, %v1608_v17  ;;  %v784_v17 = vld [vmem:[#allocation2] sm:$0xff] }
 0x22b   : > { %v2614_v36 = vsel %vm382_vm0, %v2182_v55, 0.0  ;;  %v2349_v48 = vrot.slane %v2348_v7, 1 }
 0x22c   : > { %v2401_v33 = vadd.f32 %v2400_v38, %v2399_v54  ;;  %v2615_v43 = vadd.f32 %v2614_v36, %v2613_v3  ;;  %v1853_v8 = vpop.permute.xlu1 %1852  ;;  %v2453_v57 = vsel %vm382_vm0, %v2109_v62, 0.0 }
 0x22d   : > { %v2158_v27 = vmul.f32 %v3398_v35, %v1853_v8  ;;  %v2350_v59 = vadd.f32 %v2349_v48, %v2348_v7  ;;  %v2454_v18 = vadd.f32 %v2453_v57, %v2452_v24  ;;  %v1733_v15 = vpop.permute.xlu0 %1732  ;;  %v2754_v48 = vld [vmem:[%s5635_s4 + $0x70] sm:$0xff]  ;;  %v2834_v57 = vld [vmem:[%s5637_s6] sm:$0xff] }
 0x22e   : > { %v2402_v41 = vrot.slane %v2401_v33, 2  ;;  %v2134_v51 = vmul.f32 %v3350_v23, %v1733_v15  ;;  %v2839_v15 = vld [vmem:[%s5637_s6 + $0x28] sm:$0xff] }
 0x22f   : > { %v2561_v42 = vsel %vm382_vm0, %v2158_v27, 0.0  ;;  %v2637_v56 = vsel %vm2636_vm3, %v2350_v59, %v2635_v47  ;;  %v2455_v63 = vrot.slane %v2454_v18, 4  ;;  %v2835_v59 = vld [vmem:[%s5637_s6 + $0x8] sm:$0xff] }
 0x230   : > { %v2403_v0 = vadd.f32 %v2402_v41, %v2401_v33  ;;  %v2562_v9 = vadd.f32 %v2561_v42, %v2560_v4  ;;  %v1978_v3 = vpop.permute.xlu1 %1977  ;;  %v2508_v40 = vsel %vm382_vm0, %v2134_v51, 0.0  ;;  %v2755_v41 = vld [vmem:[%s5635_s4 + $0x78] sm:$0xff]  ;;  %v2840_v51 = vld [vmem:[%s5637_s6 + $0x30] sm:$0xff] }
 0x231   : > { %v2183_v53 = vmul.f32 %v3449_v49, %v1978_v3  ;;  %v2456_v52 = vadd.f32 %v2455_v63, %v2454_v18  ;;  %v2509_v16 = vadd.f32 %v2508_v40, %v2507_v39  ;;  %v1858_v34 = vpop.permute.xlu0 %1857  ;;  %v3698_v42 = vpack.c.bf16 %v2755_v41, %v2754_v48  ;;  %v2838_v3 = vld [vmem:[%s5637_s6 + $0x20] sm:$0xff]  ;;  %v2844_v63 = vld [vmem:[%s5637_s6 + $0x50] sm:$0xff] }
 0x232   : > { %v2404_v11 = vrot.slane %v2403_v0, 1  ;;  %v2159_v22 = vmul.f32 %v3401_v50, %v1858_v34  ;;  %v2842_v50 = vld [vmem:[%s5637_s6 + $0x40] sm:$0xff] }
 0x233   : > { %v2616_v20 = vsel %vm382_vm0, %v2183_v53, 0.0  ;;  %v2457_v44 = vrot.slane %v2456_v52, 2  ;;  %v2510_v13 = vrot.slane %v2509_v16, 4  ;;  %3699 = vmatpush3.bf16.msra.mxu1 %v3698_v42  ;;  %v3707_v53 = vpack.c.bf16 %v2839_v15, %v2838_v3 }
 0x234   : > { %v2405_v26 = vadd.f32 %v2404_v11, %v2403_v0  ;;  %v2617_v2 = vadd.f32 %v2616_v20, %v2615_v43  ;;  %v1983_v24 = vpop.permute.xlu1 %1982  ;;  %v2563_v21 = vsel %vm382_vm0, %v2159_v22, 0.0  ;;  %v3701_v0 = vpack.c.bf16 %v2835_v59, %v2834_v57  ;;  %v2845_v20 = vld [vmem:[%s5637_s6 + $0x58] sm:$0xff] }
 0x235   : > { %v2184_v45 = vmul.f32 %v3450_v28, %v1983_v24  ;;  %v2458_v32 = vadd.f32 %v2457_v44, %v2456_v52  ;;  %v2511_v29 = vadd.f32 %v2510_v13, %v2509_v16  ;;  %v2564_v12 = vadd.f32 %v2563_v21, %v2562_v9  ;;  %v2837_v9 = vld [vmem:[%s5637_s6 + $0x18] sm:$0xff]  ;;  %v2847_v52 = vld [vmem:[%s5637_s6 + $0x68] sm:$0xff]  ;;  %v3043_v16 = vld [vmem:[%s5634_s3] ss:$0 sm:$0xff] }
 0x236   : > { %v2639_v5 = vsel %vm2638_vm4, %v2405_v26, %v2637_v56  ;;  %v2841_v28 = vld [vmem:[%s5637_s6 + $0x38] sm:$0xff]  ;;  %v2843_v56 = vld [vmem:[%s5637_s6 + $0x48] sm:$0xff]  ;;  %v3716_v40 = vpack.c.bf16 %v2845_v20, %v2844_v63  ;;  %v2846_v26 = vld [vmem:[%s5637_s6 + $0x60] sm:$0xff] }
 0x237   : > { %v2618_v37 = vsel %vm382_vm0, %v2184_v45, 0.0  ;;  %v2459_v54 = vrot.slane %v2458_v32, 1  ;;  %v2512_v4 = vrot.slane %v2511_v29, 2  ;;  %v2565_v46 = vrot.slane %v2564_v12, 4  ;;  %v2849_v44 = vld [vmem:[%s5637_s6 + $0x78] sm:$0xff] }
 0x238   : > { %v2619_v30 = vadd.f32 %v2618_v37, %v2617_v2  ;;  %v3710_v14 = vpack.c.bf16 %v2841_v28, %v2840_v51  ;;  %v3713_v11 = vpack.c.bf16 %v2843_v56, %v2842_v50  ;;  %v3719_v2 = vpack.c.bf16 %v2847_v52, %v2846_v26  ;;  %v3045_v13 = vld [vmem:[%s5636_s5] ss:$0 sm:$0xff] }
 0x239   : > { %v2460_v55 = vadd.f32 %v2459_v54, %v2458_v32  ;;  %v2513_v31 = vadd.f32 %v2512_v4, %v2511_v29  ;;  %v2566_v6 = vadd.f32 %v2565_v46, %v2564_v12 }
 0x23a   : > { %v2620_v10 = vrot.slane %v2619_v30, 4 }
 0x23b   : > { %v2641_v25 = vsel %vm2640_vm5, %v2460_v55, %v2639_v5  ;;  %v2514_v47 = vrot.slane %v2513_v31, 1  ;;  %v2567_v38 = vrot.slane %v2566_v6, 2  ;;  %v2848_v5 = vld [vmem:[%s5637_s6 + $0x70] sm:$0xff] }
 0x23c   : > { %v2621_v35 = vadd.f32 %v2620_v10, %v2619_v30  ;;  %v3046_v30 = vld [vmem:[%s5638_s7] ss:$0 sm:$0xff] }
 0x23d   : > { %v2515_v61 = vadd.f32 %v2514_v47, %v2513_v31  ;;  %v2568_v19 = vadd.f32 %v2567_v38, %v2566_v6 }
 0x23e   : > { %v2622_v1 = vrot.slane %v2621_v35, 2 }
 0x23f   : > { %v2643_v7 = vsel %vm2642_vm6, %v2515_v61, %v2641_v25  ;;  %v2569_v43 = vrot.slane %v2568_v19, 1 }
 0x240   : > { %v2623_v36 = vadd.f32 %v2622_v1, %v2621_v35 }
 0x241   : > { %v2570_v8 = vadd.f32 %v2569_v43, %v2568_v19 }
 0x242   : > { %v2624_v33 = vrot.slane %v2623_v36, 1 }
 0x243   : > { %v2645_v27 = vsel %vm2644_vm7, %v2570_v8, %v2643_v7 }
 0x244   : > { %v2625_v39 = vadd.f32 %v2624_v33, %v2623_v36 }
 0x246   : > { %v2647_v62 = vsel %vm2646_vm8, %v2625_v39, %v2645_v27 }
 0x247   : > { %v2649_v49 = vadd.f32 %v2647_v62, %v784_v17 }
 0x249   : > { %2650 = vst.msk [vmem:[#allocation2] sm:$0xff] %vm382_vm0, %v2649_v49 }
 0x250   : > { %v2654_v23 = vld [vmem:[#allocation2] sm:$0xff] }
 0x251   : > { %3598 = vmatmul.mubr.msk.f32.vlgmr.msra.gmra.mrb[0].mxu0 %vm382_vm0, %v2654_v23 }
 0x252   : > { %3667 = vmatprep.mubr.msk.f32.mxu0 %vm3874_vm1, %v3872_v58  ;;  %v2836_v58 = vld [vmem:[%s5637_s6 + $0x10] sm:$0xff]  ;;  %3702 = vmatpush3.bf16.msra.mxu0 %v3701_v0 }
 0x253   : > { %v3704_v18 = vpack.c.bf16 %v2837_v9, %v2836_v58  ;;  %3703 = vmatprep.subr.bf16.mxu0 %v3873_v60 }
 0x256   : > { %3705 = vmatpush3.bf16.msra.mxu0 %v3704_v18 }
 0x257   : > { %3706 = vmatprep.subr.bf16.mxu0 %v3873_v60 }
 0x25a   : > { %3708 = vmatpush3.bf16.msra.mxu0 %v3707_v53 }
 0x25b   : > { %3709 = vmatprep.subr.bf16.mxu0 %v3873_v60 }
 0x25e   : > { %3711 = vmatpush3.bf16.msra.mxu0 %v3710_v14 }
 0x25f   : > { %3712 = vmatprep.subr.bf16.mxu0 %v3873_v60 }
 0x262   : > { %3714 = vmatpush3.bf16.msra.mxu0 %v3713_v11 }
 0x263   : > { %3715 = vmatprep.subr.bf16.mxu0 %v3873_v60 }
 0x266   : > { %3717 = vmatpush3.bf16.msra.mxu0 %v3716_v40 }
 0x267   : > { %3718 = vmatprep.subr.bf16.mxu0 %v3873_v60 }
 0x26a   : > { %3720 = vmatpush3.bf16.msra.mxu0 %v3719_v2 }
 0x26b   : > { %3721 = vmatprep.subr.bf16.mxu0 %v3873_v60  ;;  %v3722_v60 = vpack.c.bf16 %v2849_v44, %v2848_v5 }
 0x26e   : > { %3723 = vmatpush3.bf16.msra.mxu0 %v3722_v60 }
 0x324   : > { %v2735_v24 = vpop.f32.mrb[0].mxu0 }
 0x325   : > { %v2736_v34 = vadd.f32 %v3043_v16, %v2735_v24  ;;  %v3599_v45 = vpop.f32.mrb[1].mxu0 }
 0x327   : > { %v2739_v22 = vmax.f32 %v2736_v34, 0.0 }
 0x329   : > { %3633 = vmatmul.mubr.f32.vlgmr.msra.gmra.mrb[0].mxu1 %v2739_v22 }
 0x3fc   : > { %v2829_v37 = vpop.f32.mrb[0].mxu1 }
 0x3fd   : > { %v2830_v21 = vadd.f32 %v3045_v13, %v2829_v37  ;;  %v3634_v32 = vpop.f32.mrb[1].mxu1 }
 0x3ff   : > { %v2833_v29 = vmax.f32 %v2830_v21, 0.0 }
 0x401   : > { %3668 = vmatmul.mubr.f32.vlgmr.msra.gmra.mrb[2].mxu0 %v2833_v29 }
 0x4d4   : > { %v2923_v12 = vpop.f32.mrb[2].mxu0 }
 0x4d5   : > { %v2924_v54 = vadd.f32 %v3046_v30, %v2923_v12  ;;  %v3669_v4 = vpop.f32.mrb[3].mxu0 }
 0x4d7   : > { %2927 = vst [vmem:[%s353_s12] sm:$0xff] %v2924_v54 }
 0x4d8   : > { %3804 = shalt.err (!%p3801_p5)
}
 0x4d9   : > { %s3805_s22 = scalar_lea.hbm %s5584_s19, 128  ;;  %s3809_s12 = scalar_lea.hbm %s5639_s8, 256 }
 0x4da   : > { %p3806_p6 = scmp.ne.s32.totalorder %s5584_s19, %s3805_s22  ;;  %p3810_p10 = scmp.lt.u32.totalorder %s5584_s19, %s5639_s8 }
 0x4db   : > { %p3811_p11 = scmp.lt.u32.totalorder %s3809_s12, %s3805_s22  ;;  %p3813_p13 = scmp.lt.u32.totalorder %s3805_s22, %s5584_s19 }
 0x4dc   : > { %p3807_p7 = pnand %p3806_p6, %p3961_p4 }
 0x4dd   : > { %p3812_p12 = por %p3811_p11, %p3810_p10 }
 0x4de   : > { %p3808_p9 = pneg %p3807_p7 }
 0x4df   : > { %p3814_p0 = por %p3813_p13, %p3812_p12 }
 0x4e1   : > { %p3815_p1 = pnand %p3814_p0, %p3808_p9 }
 0x4e3   : > { %3818 = shalt.err (!%p3815_p1)
}
 0x4e4   : > { %3726 = dma.vmem_to_hbm [thread:$0]  (%p3961_p4), %s5586_s14, 128, %s5584_s19, %s2929_s20  }
 0x4e5 PF: > { %p3732_p2 = scmp.ge.s32.totalorder %s3869_s10, 2  ;;  %s2954_s21 = sand.u32 1, %s3849_s27  }
 0x4e6   : > { %s2955_s30 = scalar_lea.sflag [#allocation4], %s2954_s21 }
 0x4e7   : > { %p3729_p3 = pnand %p3732_p2, %p3968_p8 }
 0x4e9   : > { %3844 = dma.done.wait (!%p3729_p3), %s2955_s30, 128  }
 0x4ea   : > { %3846 = vsyncadd (!%p3729_p3), %s2955_s30, 4294967168  ;;  %s21_s10 = sadd.s32 1, %s3869_s10   ;;  %s5960_s27 = smov %s3853_s28 }
 0x4eb   : > { %p18_p5 = scmp.ge.s32.totalorder %s21_s10, 4   ;;  %s5961_s28 = smov %s3857_s29 }
 0x4ec   : > { %s5962_s29 = smov %s3974_s18  ;;  %s5963_s30 = smov %s3865_s9 }
 0x4ed   : > { %s5964_s9 = smov %s5966_s13  ;;  %20 = sbr.rel (!%p18_p5) target bundleno = 4 (0x4), region = 98 }
 0x4f4   :  { %2960 = vsyncpa [#allocation4], 1 }
 0x4f5   :  { %2962 = vsyncpa [#allocation4 + $0x1], 1 }

</bundles_post_ra>
